<compile_context>
chip_gen: v7x
topology: tpu7x:2x2x1
jax: 0.10.0
libtpu: 0.0.40
codegen_flags: <defaults>
</compile_context>

<pallas_src>
import functools

import jax
import jax.numpy as jnp
from jax.experimental import pallas as pl
from jax.experimental.pallas import tpu as pltpu


# ----------------------------- fused model kernel -----------------------------
def _fused_lstm_kernel(*refs, num_layers, T, Bp, H, Cp):
    """Whole-model kernel: num_layers LSTM layers + Linear + ReLU head.

    refs (in order):
      x_ref:                 (T*Bp, D)      time-major, batch-padded, flattened input
      per layer l:
        wih_ref:             (D_l, 4H)      input->gates weight (transposed, gate
                                            columns in (i, f, o, g) order)
        whh_ref:             (H, 4H)        hidden->gates weight (transposed, same order)
        b_ref:               (1, 4H)        combined bias (b_ih + b_hh), same order
      fcw_ref:               (H, Cp)        fc weight (transposed, lane-padded)
      fcb_ref:               (1, Cp)        fc bias (lane-padded)
      out_ref:               (Bp, Cp)       output (padded batch rows / lanes included)
      scratch:
        gx_ref:              (T*Bp, 4H)     hoisted input-gate projections
        seq_ref:             (T*Bp, H)      inter-layer hidden sequence
        h_ref, c_ref:        (Bp, H)        recurrent state
    """
    x_ref = refs[0]
    layer_refs = refs[1:1 + 3 * num_layers]
    fcw_ref = refs[1 + 3 * num_layers]
    fcb_ref = refs[2 + 3 * num_layers]
    out_ref = refs[3 + 3 * num_layers]
    gx_ref, seq_ref, h_ref, c_ref = refs[4 + 3 * num_layers:]

    for layer in range(num_layers):
        wih_ref = layer_refs[3 * layer + 0]
        whh_ref = layer_refs[3 * layer + 1]
        b_ref = layer_refs[3 * layer + 2]
        is_last = layer == num_layers - 1

        # Hoisted input projection: ONE lane-dense matmul for all timesteps of
        # this layer (bias folded in), instead of T tiny matmuls in the loop.
        x_in = x_ref[...] if layer == 0 else seq_ref[...]
        gx_ref[...] = (
            jnp.dot(x_in, wih_ref[...], preferred_element_type=jnp.float32)
            + b_ref[...]
        )

        # Zero-init recurrent state for this layer (matches h_0 = c_0 = 0).
        h_ref[...] = jnp.zeros((Bp, H), jnp.float32)
        c_ref[...] = jnp.zeros((Bp, H), jnp.float32)

        # Serial recurrence over time; T is small and static -> fully unrolled.
        for t in range(T):
            row = t * Bp  # sublane-aligned (Bp == 8)
            gates = gx_ref[row:row + Bp, :] + jnp.dot(
                h_ref[...], whh_ref[...], preferred_element_type=jnp.float32
            )  # (Bp, 4H), gate order (i, f, o, g)

            # Contiguous activation slices: sigmoid over (i, f, o), tanh over g.
            sg = jax.nn.sigmoid(gates[:, 0:3 * H])
            g = jnp.tanh(gates[:, 3 * H:4 * H])
            i = sg[:, 0 * H:1 * H]
            f = sg[:, 1 * H:2 * H]
            o = sg[:, 2 * H:3 * H]

            c_new = f * c_ref[...] + i * g
            h_new = o * jnp.tanh(c_new)
            c_ref[...] = c_new
            h_ref[...] = h_new
            if not is_last:
                # Only non-final layers need the full hidden sequence (next
                # layer's input); the last layer's sequence never leaves VMEM.
                seq_ref[row:row + Bp, :] = h_new

    # FC + ReLU head on the last layer's final hidden state (t == T-1),
    # fused into the same kernel. self.dropout(out) in the module is a no-op.
    y = (
        jnp.dot(h_ref[...], fcw_ref[...], preferred_element_type=jnp.float32)
        + fcb_ref[...]
    )
    out_ref[...] = jnp.maximum(y, 0.0).astype(out_ref.dtype)


def _perm_gates_last(a):
    """Permute gate blocks along the last axis from (i, f, g, o) -> (i, f, o, g)."""
    H = a.shape[-1] // 4
    return jnp.concatenate(
        [a[..., 0:2 * H], a[..., 3 * H:4 * H], a[..., 2 * H:3 * H]], axis=-1
    )


# ------------------------------- full forward ---------------------------------
def lstm_model_forward(x, params):
    """x: (B, T, D) batch-first. Returns (B, num_classes)."""
    B, T, D = x.shape
    layers = params["lstm_layers"]
    num_layers = len(layers)
    H = layers[0][1].shape[0]
    C = params["fc_w_t"].shape[1]
    Bp = ((B + 7) // 8) * 8        # pad batch to a full sublane (8 rows)
    Cp = ((C + 127) // 128) * 128  # pad classes to a full lane group (128)

    # batch-first -> time-major, pad batch, flatten to (T*Bp, D).
    x_tm = jnp.transpose(x, (1, 0, 2)).astype(jnp.float32)
    x_tm = jnp.pad(x_tm, ((0, 0), (0, Bp - B), (0, 0)))
    x_flat = x_tm.reshape(T * Bp, D)

    flat_inputs = [x_flat]
    for (wih_t, whh_t, b) in layers:
        flat_inputs += [
            _perm_gates_last(wih_t),
            _perm_gates_last(whh_t),
            _perm_gates_last(b).reshape(1, 4 * H),
        ]
    fc_w_t = jnp.pad(params["fc_w_t"], ((0, 0), (0, Cp - C)))
    fc_b = jnp.pad(params["fc_b"], ((0, Cp - C),)).reshape(1, Cp)
    flat_inputs += [fc_w_t, fc_b]

    kernel = functools.partial(
        _fused_lstm_kernel, num_layers=num_layers, T=T, Bp=Bp, H=H, Cp=Cp
    )

    out_padded = pl.pallas_call(
        kernel,
        out_shape=jax.ShapeDtypeStruct((Bp, Cp), jnp.float32),
        scratch_shapes=[
            pltpu.VMEM((T * Bp, 4 * H), jnp.float32),  # hoisted input-gate projections
            pltpu.VMEM((T * Bp, H), jnp.float32),      # inter-layer hidden sequence
            pltpu.VMEM((Bp, H), jnp.float32),          # h state
            pltpu.VMEM((Bp, H), jnp.float32),          # c state
        ],
    )(*flat_inputs)

    return out_padded[:B, :C]  # drop padded batch rows / class lanes


# ------------------------------ pure-JAX reference ----------------------------
def lstm_model_reference(x, params):
    B, T, D = x.shape
    h_seq = jnp.transpose(x, (1, 0, 2)).astype(jnp.float32)
    for (wih_t, whh_t, b) in params["lstm_layers"]:
        H = whh_t.shape[0]
        h = jnp.zeros((B, H), jnp.float32)
        c = jnp.zeros((B, H), jnp.float32)

        def step(carry, x_t):
            h, c = carry
            gates = x_t @ wih_t + h @ whh_t + b
            i = jax.nn.sigmoid(gates[:, 0 * H:1 * H])
            f = jax.nn.sigmoid(gates[:, 1 * H:2 * H])
            g = jnp.tanh(gates[:, 2 * H:3 * H])
            o = jax.nn.sigmoid(gates[:, 3 * H:4 * H])
            c = f * c + i * g
            h = o * jnp.tanh(c)
            return (h, c), h

        (_, _), h_seq = jax.lax.scan(step, (h, c), h_seq)
    h_last = h_seq[-1]
    y = h_last @ params["fc_w_t"] + params["fc_b"]
    return jnp.maximum(y, 0.0)


# ------------------------------ param construction ----------------------------
def init_params(key, num_classes, input_size, hidden_size, num_layers):
    H = hidden_size
    bound = 1.0 / jnp.sqrt(jnp.float32(H))
    layers = []
    for layer in range(num_layers):
        d_in = input_size if layer == 0 else H
        key, k1, k2, k3, k4 = jax.random.split(key, 5)
        w_ih = jax.random.uniform(k1, (4 * H, d_in), jnp.float32, -bound, bound)
        w_hh = jax.random.uniform(k2, (4 * H, H), jnp.float32, -bound, bound)
        b_ih = jax.random.uniform(k3, (4 * H,), jnp.float32, -bound, bound)
        b_hh = jax.random.uniform(k4, (4 * H,), jnp.float32, -bound, bound)
        # store transposed weights + combined bias (PyTorch gate order i,f,g,o)
        layers.append((w_ih.T, w_hh.T, b_ih + b_hh))
    key, k5, k6 = jax.random.split(key, 3)
    fc_bound = 1.0 / jnp.sqrt(jnp.float32(H))
    fc_w = jax.random.uniform(k5, (num_classes, H), jnp.float32, -fc_bound, fc_bound)
    fc_b = jax.random.uniform(k6, (num_classes,), jnp.float32, -fc_bound, fc_bound)
    return {"lstm_layers": layers, "fc_w_t": fc_w.T, "fc_b": fc_b}


# ------------------------------------ main ------------------------------------
if __name__ == "__main__":
    num_classes = 4
    input_size = 16
    hidden_size = 32
    num_layers = 2
    seq_length = 8
    batch = 2

    key = jax.random.PRNGKey(0)
    key, kx = jax.random.split(key)
    x = jax.random.normal(kx, (batch, seq_length, input_size), jnp.float32)
    params = init_params(key, num_classes, input_size, hidden_size, num_layers)

    out = lstm_model_forward(x, params)
    out = jax.block_until_ready(out)

    ref = lstm_model_reference(x, params)
    assert out.shape == (batch, num_classes)
    assert jnp.allclose(out, ref, rtol=1e-4, atol=1e-4), (out, ref)

    print("KERNEL_OK")
</pallas_src>

<mosaic_0001>
module attributes {stable_mosaic.version = 11 : i64} {
  func.func @_fused_lstm_kernel(%arg0: memref<64x16xf32, #tpu.memory_space<vmem>>, %arg1: memref<16x128xf32, #tpu.memory_space<vmem>>, %arg2: memref<32x128xf32, #tpu.memory_space<vmem>>, %arg3: memref<1x128xf32, #tpu.memory_space<vmem>>, %arg4: memref<32x128xf32, #tpu.memory_space<vmem>>, %arg5: memref<32x128xf32, #tpu.memory_space<vmem>>, %arg6: memref<1x128xf32, #tpu.memory_space<vmem>>, %arg7: memref<32x128xf32, #tpu.memory_space<vmem>>, %arg8: memref<1x128xf32, #tpu.memory_space<vmem>>, %arg9: memref<8x128xf32, #tpu.memory_space<vmem>>, %arg10: memref<64x128xf32, #tpu.memory_space<vmem>>, %arg11: memref<64x32xf32, #tpu.memory_space<vmem>>, %arg12: memref<8x32xf32, #tpu.memory_space<vmem>>, %arg13: memref<8x32xf32, #tpu.memory_space<vmem>>) attributes {dimension_semantics = [], scalar_prefetch = 0 : i64, scratch_operands = 4 : i64, tpu.core_type = #tpu.core_type<tc>} {
    %c0 = arith.constant 0 : index
    %c0_0 = arith.constant 0 : index
    %0 = vector.load %arg0[%c0, %c0_0] : memref<64x16xf32, #tpu.memory_space<vmem>>, vector<64x16xf32>
    %c0_1 = arith.constant 0 : index
    %c0_2 = arith.constant 0 : index
    %1 = vector.load %arg1[%c0_1, %c0_2] : memref<16x128xf32, #tpu.memory_space<vmem>>, vector<16x128xf32>
    %cst = arith.constant dense<0.000000e+00> : vector<64x128xf32>
    %2 = tpu.matmul %0, %1, %cst {dimension_numbers = #tpu.dot_dimension_numbers<[1], [0], [0], [1], [0, 0, 1, 1], [], []>} : vector<64x16xf32>, vector<16x128xf32>, vector<64x128xf32> -> vector<64x128xf32>
    %c0_3 = arith.constant 0 : index
    %c0_4 = arith.constant 0 : index
    %3 = vector.load %arg3[%c0_3, %c0_4] : memref<1x128xf32, #tpu.memory_space<vmem>>, vector<1x128xf32>
    %4 = vector.broadcast %3 : vector<1x128xf32> to vector<64x128xf32>
    %5 = arith.addf %2, %4 : vector<64x128xf32>
    %c0_5 = arith.constant 0 : index
    %c0_6 = arith.constant 0 : index
    %6 = vector.load %arg10[%c0_5, %c0_6] : memref<64x128xf32, #tpu.memory_space<vmem>>, vector<64x128xf32>
    tpu.vector_store %arg10[%c0_5, %c0_6], %5 {strides = array<i32>} : memref<64x128xf32, #tpu.memory_space<vmem>>, vector<64x128xf32>,
    %cst_7 = arith.constant 0.000000e+00 : f32
    %7 = vector.broadcast %cst_7 : f32 to vector<8x32xf32>
    %c0_8 = arith.constant 0 : index
    %c0_9 = arith.constant 0 : index
    %8 = vector.load %arg12[%c0_8, %c0_9] : memref<8x32xf32, #tpu.memory_space<vmem>>, vector<8x32xf32>
    tpu.vector_store %arg12[%c0_8, %c0_9], %7 {strides = array<i32>} : memref<8x32xf32, #tpu.memory_space<vmem>>, vector<8x32xf32>,
    %cst_10 = arith.constant 0.000000e+00 : f32
    %9 = vector.broadcast %cst_10 : f32 to vector<8x32xf32>
    %c0_11 = arith.constant 0 : index
    %c0_12 = arith.constant 0 : index
    %10 = vector.load %arg13[%c0_11, %c0_12] : memref<8x32xf32, #tpu.memory_space<vmem>>, vector<8x32xf32>
    tpu.vector_store %arg13[%c0_11, %c0_12], %9 {strides = array<i32>} : memref<8x32xf32, #tpu.memory_space<vmem>>, vector<8x32xf32>,
    %c0_13 = arith.constant 0 : index
    %c0_14 = arith.constant 0 : index
    %11 = vector.load %arg10[%c0_13, %c0_14] : memref<64x128xf32, #tpu.memory_space<vmem>>, vector<8x128xf32>
    %c0_15 = arith.constant 0 : index
    %c0_16 = arith.constant 0 : index
    %12 = vector.load %arg12[%c0_15, %c0_16] : memref<8x32xf32, #tpu.memory_space<vmem>>, vector<8x32xf32>
    %c0_17 = arith.constant 0 : index
    %c0_18 = arith.constant 0 : index
    %13 = vector.load %arg2[%c0_17, %c0_18] : memref<32x128xf32, #tpu.memory_space<vmem>>, vector<32x128xf32>
    %cst_19 = arith.constant dense<0.000000e+00> : vector<8x128xf32>
    %14 = tpu.matmul %12, %13, %cst_19 {dimension_numbers = #tpu.dot_dimension_numbers<[1], [0], [0], [1], [0, 0, 1, 1], [], []>} : vector<8x32xf32>, vector<32x128xf32>, vector<8x128xf32> -> vector<8x128xf32>
    %15 = arith.addf %11, %14 : vector<8x128xf32>
    %16 = vector.extract_strided_slice %15 {offsets = [0, 0], sizes = [8, 96], strides = [1, 1]} : vector<8x128xf32> to vector<8x96xf32>
    %17 = arith.negf %16 : vector<8x96xf32>
    %18 = math.exp %17 : vector<8x96xf32>
    %cst_20 = arith.constant 1.000000e+00 : f32
    %19 = vector.broadcast %cst_20 : f32 to vector<8x96xf32>
    %20 = arith.addf %19, %18 : vector<8x96xf32>
    %21 = arith.divf %19, %20 : vector<8x96xf32>
    %22 = vector.extract_strided_slice %15 {offsets = [0, 96], sizes = [8, 32], strides = [1, 1]} : vector<8x128xf32> to vector<8x32xf32>
    %23 = math.tanh %22 : vector<8x32xf32>
    %24 = vector.extract_strided_slice %21 {offsets = [0, 0], sizes = [8, 32], strides = [1, 1]} : vector<8x96xf32> to vector<8x32xf32>
    %25 = vector.extract_strided_slice %21 {offsets = [0, 32], sizes = [8, 32], strides = [1, 1]} : vector<8x96xf32> to vector<8x32xf32>
    %26 = vector.extract_strided_slice %21 {offsets = [0, 64], sizes = [8, 32], strides = [1, 1]} : vector<8x96xf32> to vector<8x32xf32>
    %c0_21 = arith.constant 0 : index
    %c0_22 = arith.constant 0 : index
    %27 = vector.load %arg13[%c0_21, %c0_22] : memref<8x32xf32, #tpu.memory_space<vmem>>, vector<8x32xf32>
    %28 = arith.mulf %25, %27 : vector<8x32xf32>
    %29 = arith.mulf %24, %23 : vector<8x32xf32>
    %30 = arith.addf %28, %29 : vector<8x32xf32>
    %31 = math.tanh %30 : vector<8x32xf32>
    %32 = arith.mulf %26, %31 : vector<8x32xf32>
    %c0_23 = arith.constant 0 : index
    %c0_24 = arith.constant 0 : index
    %33 = vector.load %arg13[%c0_23, %c0_24] : memref<8x32xf32, #tpu.memory_space<vmem>>, vector<8x32xf32>
    tpu.vector_store %arg13[%c0_23, %c0_24], %30 {strides = array<i32>} : memref<8x32xf32, #tpu.memory_space<vmem>>, vector<8x32xf32>,
    %c0_25 = arith.constant 0 : index
    %c0_26 = arith.constant 0 : index
    %34 = vector.load %arg12[%c0_25, %c0_26] : memref<8x32xf32, #tpu.memory_space<vmem>>, vector<8x32xf32>
    tpu.vector_store %arg12[%c0_25, %c0_26], %32 {strides = array<i32>} : memref<8x32xf32, #tpu.memory_space<vmem>>, vector<8x32xf32>,
    %c0_27 = arith.constant 0 : index
    %c0_28 = arith.constant 0 : index
    %35 = vector.load %arg11[%c0_27, %c0_28] : memref<64x32xf32, #tpu.memory_space<vmem>>, vector<8x32xf32>
    tpu.vector_store %arg11[%c0_27, %c0_28], %32 {strides = array<i32>} : memref<64x32xf32, #tpu.memory_space<vmem>>, vector<8x32xf32>,
    %c8 = arith.constant 8 : index
    %c0_29 = arith.constant 0 : index
    %36 = vector.load %arg10[%c8, %c0_29] : memref<64x128xf32, #tpu.memory_space<vmem>>, vector<8x128xf32>
    %c0_30 = arith.constant 0 : index
    %c0_31 = arith.constant 0 : index
    %37 = vector.load %arg12[%c0_30, %c0_31] : memref<8x32xf32, #tpu.memory_space<vmem>>, vector<8x32xf32>
    %c0_32 = arith.constant 0 : index
    %c0_33 = arith.constant 0 : index
    %38 = vector.load %arg2[%c0_32, %c0_33] : memref<32x128xf32, #tpu.memory_space<vmem>>, vector<32x128xf32>
    %cst_34 = arith.constant dense<0.000000e+00> : vector<8x128xf32>
    %39 = tpu.matmul %37, %38, %cst_34 {dimension_numbers = #tpu.dot_dimension_numbers<[1], [0], [0], [1], [0, 0, 1, 1], [], []>} : vector<8x32xf32>, vector<32x128xf32>, vector<8x128xf32> -> vector<8x128xf32>
    %40 = arith.addf %36, %39 : vector<8x128xf32>
    %41 = vector.extract_strided_slice %40 {offsets = [0, 0], sizes = [8, 96], strides = [1, 1]} : vector<8x128xf32> to vector<8x96xf32>
    %42 = arith.negf %41 : vector<8x96xf32>
    %43 = math.exp %42 : vector<8x96xf32>
    %cst_35 = arith.constant 1.000000e+00 : f32
    %44 = vector.broadcast %cst_35 : f32 to vector<8x96xf32>
    %45 = arith.addf %44, %43 : vector<8x96xf32>
    %46 = arith.divf %44, %45 : vector<8x96xf32>
    %47 = vector.extract_strided_slice %40 {offsets = [0, 96], sizes = [8, 32], strides = [1, 1]} : vector<8x128xf32> to vector<8x32xf32>
    %48 = math.tanh %47 : vector<8x32xf32>
    %49 = vector.extract_strided_slice %46 {offsets = [0, 0], sizes = [8, 32], strides = [1, 1]} : vector<8x96xf32> to vector<8x32xf32>
    %50 = vector.extract_strided_slice %46 {offsets = [0, 32], sizes = [8, 32], strides = [1, 1]} : vector<8x96xf32> to vector<8x32xf32>
    %51 = vector.extract_strided_slice %46 {offsets = [0, 64], sizes = [8, 32], strides = [1, 1]} : vector<8x96xf32> to vector<8x32xf32>
    %c0_36 = arith.constant 0 : index
    %c0_37 = arith.constant 0 : index
    %52 = vector.load %arg13[%c0_36, %c0_37] : memref<8x32xf32, #tpu.memory_space<vmem>>, vector<8x32xf32>
    %53 = arith.mulf %50, %52 : vector<8x32xf32>
    %54 = arith.mulf %49, %48 : vector<8x32xf32>
    %55 = arith.addf %53, %54 : vector<8x32xf32>
    %56 = math.tanh %55 : vector<8x32xf32>
    %57 = arith.mulf %51, %56 : vector<8x32xf32>
    %c0_38 = arith.constant 0 : index
    %c0_39 = arith.constant 0 : index
    %58 = vector.load %arg13[%c0_38, %c0_39] : memref<8x32xf32, #tpu.memory_space<vmem>>, vector<8x32xf32>
    tpu.vector_store %arg13[%c0_38, %c0_39], %55 {strides = array<i32>} : memref<8x32xf32, #tpu.memory_space<vmem>>, vector<8x32xf32>,
    %c0_40 = arith.constant 0 : index
    %c0_41 = arith.constant 0 : index
    %59 = vector.load %arg12[%c0_40, %c0_41] : memref<8x32xf32, #tpu.memory_space<vmem>>, vector<8x32xf32>
    tpu.vector_store %arg12[%c0_40, %c0_41], %57 {strides = array<i32>} : memref<8x32xf32, #tpu.memory_space<vmem>>, vector<8x32xf32>,
    %c8_42 = arith.constant 8 : index
    %c0_43 = arith.constant 0 : index
    %60 = vector.load %arg11[%c8_42, %c0_43] : memref<64x32xf32, #tpu.memory_space<vmem>>, vector<8x32xf32>
    tpu.vector_store %arg11[%c8_42, %c0_43], %57 {strides = array<i32>} : memref<64x32xf32, #tpu.memory_space<vmem>>, vector<8x32xf32>,
    %c16 = arith.constant 16 : index
    %c0_44 = arith.constant 0 : index
    %61 = vector.load %arg10[%c16, %c0_44] : memref<64x128xf32, #tpu.memory_space<vmem>>, vector<8x128xf32>
    %c0_45 = arith.constant 0 : index
    %c0_46 = arith.constant 0 : index
    %62 = vector.load %arg12[%c0_45, %c0_46] : memref<8x32xf32, #tpu.memory_space<vmem>>, vector<8x32xf32>
    %c0_47 = arith.constant 0 : index
    %c0_48 = arith.constant 0 : index
    %63 = vector.load %arg2[%c0_47, %c0_48] : memref<32x128xf32, #tpu.memory_space<vmem>>, vector<32x128xf32>
    %cst_49 = arith.constant dense<0.000000e+00> : vector<8x128xf32>
    %64 = tpu.matmul %62, %63, %cst_49 {dimension_numbers = #tpu.dot_dimension_numbers<[1], [0], [0], [1], [0, 0, 1, 1], [], []>} : vector<8x32xf32>, vector<32x128xf32>, vector<8x128xf32> -> vector<8x128xf32>
    %65 = arith.addf %61, %64 : vector<8x128xf32>
    %66 = vector.extract_strided_slice %65 {offsets = [0, 0], sizes = [8, 96], strides = [1, 1]} : vector<8x128xf32> to vector<8x96xf32>
    %67 = arith.negf %66 : vector<8x96xf32>
    %68 = math.exp %67 : vector<8x96xf32>
    %cst_50 = arith.constant 1.000000e+00 : f32
    %69 = vector.broadcast %cst_50 : f32 to vector<8x96xf32>
    %70 = arith.addf %69, %68 : vector<8x96xf32>
    %71 = arith.divf %69, %70 : vector<8x96xf32>
    %72 = vector.extract_strided_slice %65 {offsets = [0, 96], sizes = [8, 32], strides = [1, 1]} : vector<8x128xf32> to vector<8x32xf32>
    %73 = math.tanh %72 : vector<8x32xf32>
    %74 = vector.extract_strided_slice %71 {offsets = [0, 0], sizes = [8, 32], strides = [1, 1]} : vector<8x96xf32> to vector<8x32xf32>
    %75 = vector.extract_strided_slice %71 {offsets = [0, 32], sizes = [8, 32], strides = [1, 1]} : vector<8x96xf32> to vector<8x32xf32>
    %76 = vector.extract_strided_slice %71 {offsets = [0, 64], sizes = [8, 32], strides = [1, 1]} : vector<8x96xf32> to vector<8x32xf32>
    %c0_51 = arith.constant 0 : index
    %c0_52 = arith.constant 0 : index
    %77 = vector.load %arg13[%c0_51, %c0_52] : memref<8x32xf32, #tpu.memory_space<vmem>>, vector<8x32xf32>
    %78 = arith.mulf %75, %77 : vector<8x32xf32>
    %79 = arith.mulf %74, %73 : vector<8x32xf32>
    %80 = arith.addf %78, %79 : vector<8x32xf32>
    %81 = math.tanh %80 : vector<8x32xf32>
    %82 = arith.mulf %76, %81 : vector<8x32xf32>
    %c0_53 = arith.constant 0 : index
    %c0_54 = arith.constant 0 : index
    %83 = vector.load %arg13[%c0_53, %c0_54] : memref<8x32xf32, #tpu.memory_space<vmem>>, vector<8x32xf32>
    tpu.vector_store %arg13[%c0_53, %c0_54], %80 {strides = array<i32>} : memref<8x32xf32, #tpu.memory_space<vmem>>, vector<8x32xf32>,
    %c0_55 = arith.constant 0 : index
    %c0_56 = arith.constant 0 : index
    %84 = vector.load %arg12[%c0_55, %c0_56] : memref<8x32xf32, #tpu.memory_space<vmem>>, vector<8x32xf32>
    tpu.vector_store %arg12[%c0_55, %c0_56], %82 {strides = array<i32>} : memref<8x32xf32, #tpu.memory_space<vmem>>, vector<8x32xf32>,
    %c16_57 = arith.constant 16 : index
    %c0_58 = arith.constant 0 : index
    %85 = vector.load %arg11[%c16_57, %c0_58] : memref<64x32xf32, #tpu.memory_space<vmem>>, vector<8x32xf32>
    tpu.vector_store %arg11[%c16_57, %c0_58], %82 {strides = array<i32>} : memref<64x32xf32, #tpu.memory_space<vmem>>, vector<8x32xf32>,
    %c24 = arith.constant 24 : index
    %c0_59 = arith.constant 0 : index
    %86 = vector.load %arg10[%c24, %c0_59] : memref<64x128xf32, #tpu.memory_space<vmem>>, vector<8x128xf32>
    %c0_60 = arith.constant 0 : index
    %c0_61 = arith.constant 0 : index
    %87 = vector.load %arg12[%c0_60, %c0_61] : memref<8x32xf32, #tpu.memory_space<vmem>>, vector<8x32xf32>
    %c0_62 = arith.constant 0 : index
    %c0_63 = arith.constant 0 : index
    %88 = vector.load %arg2[%c0_62, %c0_63] : memref<32x128xf32, #tpu.memory_space<vmem>>, vector<32x128xf32>
    %cst_64 = arith.constant dense<0.000000e+00> : vector<8x128xf32>
    %89 = tpu.matmul %87, %88, %cst_64 {dimension_numbers = #tpu.dot_dimension_numbers<[1], [0], [0], [1], [0, 0, 1, 1], [], []>} : vector<8x32xf32>, vector<32x128xf32>, vector<8x128xf32> -> vector<8x128xf32>
    %90 = arith.addf %86, %89 : vector<8x128xf32>
    %91 = vector.extract_strided_slice %90 {offsets = [0, 0], sizes = [8, 96], strides = [1, 1]} : vector<8x128xf32> to vector<8x96xf32>
    %92 = arith.negf %91 : vector<8x96xf32>
    %93 = math.exp %92 : vector<8x96xf32>
    %cst_65 = arith.constant 1.000000e+00 : f32
    %94 = vector.broadcast %cst_65 : f32 to vector<8x96xf32>
    %95 = arith.addf %94, %93 : vector<8x96xf32>
    %96 = arith.divf %94, %95 : vector<8x96xf32>
    %97 = vector.extract_strided_slice %90 {offsets = [0, 96], sizes = [8, 32], strides = [1, 1]} : vector<8x128xf32> to vector<8x32xf32>
    %98 = math.tanh %97 : vector<8x32xf32>
    %99 = vector.extract_strided_slice %96 {offsets = [0, 0], sizes = [8, 32], strides = [1, 1]} : vector<8x96xf32> to vector<8x32xf32>
    %100 = vector.extract_strided_slice %96 {offsets = [0, 32], sizes = [8, 32], strides = [1, 1]} : vector<8x96xf32> to vector<8x32xf32>
    %101 = vector.extract_strided_slice %96 {offsets = [0, 64], sizes = [8, 32], strides = [1, 1]} : vector<8x96xf32> to vector<8x32xf32>
    %c0_66 = arith.constant 0 : index
    %c0_67 = arith.constant 0 : index
    %102 = vector.load %arg13[%c0_66, %c0_67] : memref<8x32xf32, #tpu.memory_space<vmem>>, vector<8x32xf32>
    %103 = arith.mulf %100, %102 : vector<8x32xf32>
    %104 = arith.mulf %99, %98 : vector<8x32xf32>
    %105 = arith.addf %103, %104 : vector<8x32xf32>
    %106 = math.tanh %105 : vector<8x32xf32>
    %107 = arith.mulf %101, %106 : vector<8x32xf32>
    %c0_68 = arith.constant 0 : index
    %c0_69 = arith.constant 0 : index
    %108 = vector.load %arg13[%c0_68, %c0_69] : memref<8x32xf32, #tpu.memory_space<vmem>>, vector<8x32xf32>
    tpu.vector_store %arg13[%c0_68, %c0_69], %105 {strides = array<i32>} : memref<8x32xf32, #tpu.memory_space<vmem>>, vector<8x32xf32>,
    %c0_70 = arith.constant 0 : index
    %c0_71 = arith.constant 0 : index
    %109 = vector.load %arg12[%c0_70, %c0_71] : memref<8x32xf32, #tpu.memory_space<vmem>>, vector<8x32xf32>
    tpu.vector_store %arg12[%c0_70, %c0_71], %107 {strides = array<i32>} : memref<8x32xf32, #tpu.memory_space<vmem>>, vector<8x32xf32>,
    %c24_72 = arith.constant 24 : index
    %c0_73 = arith.constant 0 : index
    %110 = vector.load %arg11[%c24_72, %c0_73] : memref<64x32xf32, #tpu.memory_space<vmem>>, vector<8x32xf32>
    tpu.vector_store %arg11[%c24_72, %c0_73], %107 {strides = array<i32>} : memref<64x32xf32, #tpu.memory_space<vmem>>, vector<8x32xf32>,
    %c32 = arith.constant 32 : index
    %c0_74 = arith.constant 0 : index
    %111 = vector.load %arg10[%c32, %c0_74] : memref<64x128xf32, #tpu.memory_space<vmem>>, vector<8x128xf32>
    %c0_75 = arith.constant 0 : index
    %c0_76 = arith.constant 0 : index
    %112 = vector.load %arg12[%c0_75, %c0_76] : memref<8x32xf32, #tpu.memory_space<vmem>>, vector<8x32xf32>
    %c0_77 = arith.constant 0 : index
    %c0_78 = arith.constant 0 : index
    %113 = vector.load %arg2[%c0_77, %c0_78] : memref<32x128xf32, #tpu.memory_space<vmem>>, vector<32x128xf32>
    %cst_79 = arith.constant dense<0.000000e+00> : vector<8x128xf32>
    %114 = tpu.matmul %112, %113, %cst_79 {dimension_numbers = #tpu.dot_dimension_numbers<[1], [0], [0], [1], [0, 0, 1, 1], [], []>} : vector<8x32xf32>, vector<32x128xf32>, vector<8x128xf32> -> vector<8x128xf32>
    %115 = arith.addf %111, %114 : vector<8x128xf32>
    %116 = vector.extract_strided_slice %115 {offsets = [0, 0], sizes = [8, 96], strides = [1, 1]} : vector<8x128xf32> to vector<8x96xf32>
    %117 = arith.negf %116 : vector<8x96xf32>
    %118 = math.exp %117 : vector<8x96xf32>
    %cst_80 = arith.constant 1.000000e+00 : f32
    %119 = vector.broadcast %cst_80 : f32 to vector<8x96xf32>
    %120 = arith.addf %119, %118 : vector<8x96xf32>
    %121 = arith.divf %119, %120 : vector<8x96xf32>
    %122 = vector.extract_strided_slice %115 {offsets = [0, 96], sizes = [8, 32], strides = [1, 1]} : vector<8x128xf32> to vector<8x32xf32>
    %123 = math.tanh %122 : vector<8x32xf32>
    %124 = vector.extract_strided_slice %121 {offsets = [0, 0], sizes = [8, 32], strides = [1, 1]} : vector<8x96xf32> to vector<8x32xf32>
    %125 = vector.extract_strided_slice %121 {offsets = [0, 32], sizes = [8, 32], strides = [1, 1]} : vector<8x96xf32> to vector<8x32xf32>
    %126 = vector.extract_strided_slice %121 {offsets = [0, 64], sizes = [8, 32], strides = [1, 1]} : vector<8x96xf32> to vector<8x32xf32>
    %c0_81 = arith.constant 0 : index
    %c0_82 = arith.constant 0 : index
    %127 = vector.load %arg13[%c0_81, %c0_82] : memref<8x32xf32, #tpu.memory_space<vmem>>, vector<8x32xf32>
    %128 = arith.mulf %125, %127 : vector<8x32xf32>
    %129 = arith.mulf %124, %123 : vector<8x32xf32>
    %130 = arith.addf %128, %129 : vector<8x32xf32>
    %131 = math.tanh %130 : vector<8x32xf32>
    %132 = arith.mulf %126, %131 : vector<8x32xf32>
    %c0_83 = arith.constant 0 : index
    %c0_84 = arith.constant 0 : index
    %133 = vector.load %arg13[%c0_83, %c0_84] : memref<8x32xf32, #tpu.memory_space<vmem>>, vector<8x32xf32>
    tpu.vector_store %arg13[%c0_83, %c0_84], %130 {strides = array<i32>} : memref<8x32xf32, #tpu.memory_space<vmem>>, vector<8x32xf32>,
    %c0_85 = arith.constant 0 : index
    %c0_86 = arith.constant 0 : index
    %134 = vector.load %arg12[%c0_85, %c0_86] : memref<8x32xf32, #tpu.memory_space<vmem>>, vector<8x32xf32>
    tpu.vector_store %arg12[%c0_85, %c0_86], %132 {strides = array<i32>} : memref<8x32xf32, #tpu.memory_space<vmem>>, vector<8x32xf32>,
    %c32_87 = arith.constant 32 : index
    %c0_88 = arith.constant 0 : index
    %135 = vector.load %arg11[%c32_87, %c0_88] : memref<64x32xf32, #tpu.memory_space<vmem>>, vector<8x32xf32>
    tpu.vector_store %arg11[%c32_87, %c0_88], %132 {strides = array<i32>} : memref<64x32xf32, #tpu.memory_space<vmem>>, vector<8x32xf32>,
    %c40 = arith.constant 40 : index
    %c0_89 = arith.constant 0 : index
    %136 = vector.load %arg10[%c40, %c0_89] : memref<64x128xf32, #tpu.memory_space<vmem>>, vector<8x128xf32>
    %c0_90 = arith.constant 0 : index
    %c0_91 = arith.constant 0 : index
    %137 = vector.load %arg12[%c0_90, %c0_91] : memref<8x32xf32, #tpu.memory_space<vmem>>, vector<8x32xf32>
    %c0_92 = arith.constant 0 : index
    %c0_93 = arith.constant 0 : index
    %138 = vector.load %arg2[%c0_92, %c0_93] : memref<32x128xf32, #tpu.memory_space<vmem>>, vector<32x128xf32>
    %cst_94 = arith.constant dense<0.000000e+00> : vector<8x128xf32>
    %139 = tpu.matmul %137, %138, %cst_94 {dimension_numbers = #tpu.dot_dimension_numbers<[1], [0], [0], [1], [0, 0, 1, 1], [], []>} : vector<8x32xf32>, vector<32x128xf32>, vector<8x128xf32> -> vector<8x128xf32>
    %140 = arith.addf %136, %139 : vector<8x128xf32>
    %141 = vector.extract_strided_slice %140 {offsets = [0, 0], sizes = [8, 96], strides = [1, 1]} : vector<8x128xf32> to vector<8x96xf32>
    %142 = arith.negf %141 : vector<8x96xf32>
    %143 = math.exp %142 : vector<8x96xf32>
    %cst_95 = arith.constant 1.000000e+00 : f32
    %144 = vector.broadcast %cst_95 : f32 to vector<8x96xf32>
    %145 = arith.addf %144, %143 : vector<8x96xf32>
    %146 = arith.divf %144, %145 : vector<8x96xf32>
    %147 = vector.extract_strided_slice %140 {offsets = [0, 96], sizes = [8, 32], strides = [1, 1]} : vector<8x128xf32> to vector<8x32xf32>
    %148 = math.tanh %147 : vector<8x32xf32>
    %149 = vector.extract_strided_slice %146 {offsets = [0, 0], sizes = [8, 32], strides = [1, 1]} : vector<8x96xf32> to vector<8x32xf32>
    %150 = vector.extract_strided_slice %146 {offsets = [0, 32], sizes = [8, 32], strides = [1, 1]} : vector<8x96xf32> to vector<8x32xf32>
    %151 = vector.extract_strided_slice %146 {offsets = [0, 64], sizes = [8, 32], strides = [1, 1]} : vector<8x96xf32> to vector<8x32xf32>
    %c0_96 = arith.constant 0 : index
    %c0_97 = arith.constant 0 : index
    %152 = vector.load %arg13[%c0_96, %c0_97] : memref<8x32xf32, #tpu.memory_space<vmem>>, vector<8x32xf32>
    %153 = arith.mulf %150, %152 : vector<8x32xf32>
    %154 = arith.mulf %149, %148 : vector<8x32xf32>
    %155 = arith.addf %153, %154 : vector<8x32xf32>
    %156 = math.tanh %155 : vector<8x32xf32>
    %157 = arith.mulf %151, %156 : vector<8x32xf32>
    %c0_98 = arith.constant 0 : index
    %c0_99 = arith.constant 0 : index
    %158 = vector.load %arg13[%c0_98, %c0_99] : memref<8x32xf32, #tpu.memory_space<vmem>>, vector<8x32xf32>
    tpu.vector_store %arg13[%c0_98, %c0_99], %155 {strides = array<i32>} : memref<8x32xf32, #tpu.memory_space<vmem>>, vector<8x32xf32>,
    %c0_100 = arith.constant 0 : index
    %c0_101 = arith.constant 0 : index
    %159 = vector.load %arg12[%c0_100, %c0_101] : memref<8x32xf32, #tpu.memory_space<vmem>>, vector<8x32xf32>
    tpu.vector_store %arg12[%c0_100, %c0_101], %157 {strides = array<i32>} : memref<8x32xf32, #tpu.memory_space<vmem>>, vector<8x32xf32>,
    %c40_102 = arith.constant 40 : index
    %c0_103 = arith.constant 0 : index
    %160 = vector.load %arg11[%c40_102, %c0_103] : memref<64x32xf32, #tpu.memory_space<vmem>>, vector<8x32xf32>
    tpu.vector_store %arg11[%c40_102, %c0_103], %157 {strides = array<i32>} : memref<64x32xf32, #tpu.memory_space<vmem>>, vector<8x32xf32>,
    %c48 = arith.constant 48 : index
    %c0_104 = arith.constant 0 : index
    %161 = vector.load %arg10[%c48, %c0_104] : memref<64x128xf32, #tpu.memory_space<vmem>>, vector<8x128xf32>
    %c0_105 = arith.constant 0 : index
    %c0_106 = arith.constant 0 : index
    %162 = vector.load %arg12[%c0_105, %c0_106] : memref<8x32xf32, #tpu.memory_space<vmem>>, vector<8x32xf32>
    %c0_107 = arith.constant 0 : index
    %c0_108 = arith.constant 0 : index
    %163 = vector.load %arg2[%c0_107, %c0_108] : memref<32x128xf32, #tpu.memory_space<vmem>>, vector<32x128xf32>
    %cst_109 = arith.constant dense<0.000000e+00> : vector<8x128xf32>
    %164 = tpu.matmul %162, %163, %cst_109 {dimension_numbers = #tpu.dot_dimension_numbers<[1], [0], [0], [1], [0, 0, 1, 1], [], []>} : vector<8x32xf32>, vector<32x128xf32>, vector<8x128xf32> -> vector<8x128xf32>
    %165 = arith.addf %161, %164 : vector<8x128xf32>
    %166 = vector.extract_strided_slice %165 {offsets = [0, 0], sizes = [8, 96], strides = [1, 1]} : vector<8x128xf32> to vector<8x96xf32>
    %167 = arith.negf %166 : vector<8x96xf32>
    %168 = math.exp %167 : vector<8x96xf32>
    %cst_110 = arith.constant 1.000000e+00 : f32
    %169 = vector.broadcast %cst_110 : f32 to vector<8x96xf32>
    %170 = arith.addf %169, %168 : vector<8x96xf32>
    %171 = arith.divf %169, %170 : vector<8x96xf32>
    %172 = vector.extract_strided_slice %165 {offsets = [0, 96], sizes = [8, 32], strides = [1, 1]} : vector<8x128xf32> to vector<8x32xf32>
    %173 = math.tanh %172 : vector<8x32xf32>
    %174 = vector.extract_strided_slice %171 {offsets = [0, 0], sizes = [8, 32], strides = [1, 1]} : vector<8x96xf32> to vector<8x32xf32>
    %175 = vector.extract_strided_slice %171 {offsets = [0, 32], sizes = [8, 32], strides = [1, 1]} : vector<8x96xf32> to vector<8x32xf32>
    %176 = vector.extract_strided_slice %171 {offsets = [0, 64], sizes = [8, 32], strides = [1, 1]} : vector<8x96xf32> to vector<8x32xf32>
    %c0_111 = arith.constant 0 : index
    %c0_112 = arith.constant 0 : index
    %177 = vector.load %arg13[%c0_111, %c0_112] : memref<8x32xf32, #tpu.memory_space<vmem>>, vector<8x32xf32>
    %178 = arith.mulf %175, %177 : vector<8x32xf32>
    %179 = arith.mulf %174, %173 : vector<8x32xf32>
    %180 = arith.addf %178, %179 : vector<8x32xf32>
    %181 = math.tanh %180 : vector<8x32xf32>
    %182 = arith.mulf %176, %181 : vector<8x32xf32>
    %c0_113 = arith.constant 0 : index
    %c0_114 = arith.constant 0 : index
    %183 = vector.load %arg13[%c0_113, %c0_114] : memref<8x32xf32, #tpu.memory_space<vmem>>, vector<8x32xf32>
    tpu.vector_store %arg13[%c0_113, %c0_114], %180 {strides = array<i32>} : memref<8x32xf32, #tpu.memory_space<vmem>>, vector<8x32xf32>,
    %c0_115 = arith.constant 0 : index
    %c0_116 = arith.constant 0 : index
    %184 = vector.load %arg12[%c0_115, %c0_116] : memref<8x32xf32, #tpu.memory_space<vmem>>, vector<8x32xf32>
    tpu.vector_store %arg12[%c0_115, %c0_116], %182 {strides = array<i32>} : memref<8x32xf32, #tpu.memory_space<vmem>>, vector<8x32xf32>,
    %c48_117 = arith.constant 48 : index
    %c0_118 = arith.constant 0 : index
    %185 = vector.load %arg11[%c48_117, %c0_118] : memref<64x32xf32, #tpu.memory_space<vmem>>, vector<8x32xf32>
    tpu.vector_store %arg11[%c48_117, %c0_118], %182 {strides = array<i32>} : memref<64x32xf32, #tpu.memory_space<vmem>>, vector<8x32xf32>,
    %c56 = arith.constant 56 : index
    %c0_119 = arith.constant 0 : index
    %186 = vector.load %arg10[%c56, %c0_119] : memref<64x128xf32, #tpu.memory_space<vmem>>, vector<8x128xf32>
    %c0_120 = arith.constant 0 : index
    %c0_121 = arith.constant 0 : index
    %187 = vector.load %arg12[%c0_120, %c0_121] : memref<8x32xf32, #tpu.memory_space<vmem>>, vector<8x32xf32>
    %c0_122 = arith.constant 0 : index
    %c0_123 = arith.constant 0 : index
    %188 = vector.load %arg2[%c0_122, %c0_123] : memref<32x128xf32, #tpu.memory_space<vmem>>, vector<32x128xf32>
    %cst_124 = arith.constant dense<0.000000e+00> : vector<8x128xf32>
    %189 = tpu.matmul %187, %188, %cst_124 {dimension_numbers = #tpu.dot_dimension_numbers<[1], [0], [0], [1], [0, 0, 1, 1], [], []>} : vector<8x32xf32>, vector<32x128xf32>, vector<8x128xf32> -> vector<8x128xf32>
    %190 = arith.addf %186, %189 : vector<8x128xf32>
    %191 = vector.extract_strided_slice %190 {offsets = [0, 0], sizes = [8, 96], strides = [1, 1]} : vector<8x128xf32> to vector<8x96xf32>
    %192 = arith.negf %191 : vector<8x96xf32>
    %193 = math.exp %192 : vector<8x96xf32>
    %cst_125 = arith.constant 1.000000e+00 : f32
    %194 = vector.broadcast %cst_125 : f32 to vector<8x96xf32>
    %195 = arith.addf %194, %193 : vector<8x96xf32>
    %196 = arith.divf %194, %195 : vector<8x96xf32>
    %197 = vector.extract_strided_slice %190 {offsets = [0, 96], sizes = [8, 32], strides = [1, 1]} : vector<8x128xf32> to vector<8x32xf32>
    %198 = math.tanh %197 : vector<8x32xf32>
    %199 = vector.extract_strided_slice %196 {offsets = [0, 0], sizes = [8, 32], strides = [1, 1]} : vector<8x96xf32> to vector<8x32xf32>
    %200 = vector.extract_strided_slice %196 {offsets = [0, 32], sizes = [8, 32], strides = [1, 1]} : vector<8x96xf32> to vector<8x32xf32>
    %201 = vector.extract_strided_slice %196 {offsets = [0, 64], sizes = [8, 32], strides = [1, 1]} : vector<8x96xf32> to vector<8x32xf32>
    %c0_126 = arith.constant 0 : index
    %c0_127 = arith.constant 0 : index
    %202 = vector.load %arg13[%c0_126, %c0_127] : memref<8x32xf32, #tpu.memory_space<vmem>>, vector<8x32xf32>
    %203 = arith.mulf %200, %202 : vector<8x32xf32>
    %204 = arith.mulf %199, %198 : vector<8x32xf32>
    %205 = arith.addf %203, %204 : vector<8x32xf32>
    %206 = math.tanh %205 : vector<8x32xf32>
    %207 = arith.mulf %201, %206 : vector<8x32xf32>
    %c0_128 = arith.constant 0 : index
    %c0_129 = arith.constant 0 : index
    %208 = vector.load %arg13[%c0_128, %c0_129] : memref<8x32xf32, #tpu.memory_space<vmem>>, vector<8x32xf32>
    tpu.vector_store %arg13[%c0_128, %c0_129], %205 {strides = array<i32>} : memref<8x32xf32, #tpu.memory_space<vmem>>, vector<8x32xf32>,
    %c0_130 = arith.constant 0 : index
    %c0_131 = arith.constant 0 : index
    %209 = vector.load %arg12[%c0_130, %c0_131] : memref<8x32xf32, #tpu.memory_space<vmem>>, vector<8x32xf32>
    tpu.vector_store %arg12[%c0_130, %c0_131], %207 {strides = array<i32>} : memref<8x32xf32, #tpu.memory_space<vmem>>, vector<8x32xf32>,
    %c56_132 = arith.constant 56 : index
    %c0_133 = arith.constant 0 : index
    %210 = vector.load %arg11[%c56_132, %c0_133] : memref<64x32xf32, #tpu.memory_space<vmem>>, vector<8x32xf32>
    tpu.vector_store %arg11[%c56_132, %c0_133], %207 {strides = array<i32>} : memref<64x32xf32, #tpu.memory_space<vmem>>, vector<8x32xf32>,
    %c0_134 = arith.constant 0 : index
    %c0_135 = arith.constant 0 : index
    %211 = vector.load %arg11[%c0_134, %c0_135] : memref<64x32xf32, #tpu.memory_space<vmem>>, vector<64x32xf32>
    %c0_136 = arith.constant 0 : index
    %c0_137 = arith.constant 0 : index
    %212 = vector.load %arg4[%c0_136, %c0_137] : memref<32x128xf32, #tpu.memory_space<vmem>>, vector<32x128xf32>
    %cst_138 = arith.constant dense<0.000000e+00> : vector<64x128xf32>
    %213 = tpu.matmul %211, %212, %cst_138 {dimension_numbers = #tpu.dot_dimension_numbers<[1], [0], [0], [1], [0, 0, 1, 1], [], []>} : vector<64x32xf32>, vector<32x128xf32>, vector<64x128xf32> -> vector<64x128xf32>
    %c0_139 = arith.constant 0 : index
    %c0_140 = arith.constant 0 : index
    %214 = vector.load %arg6[%c0_139, %c0_140] : memref<1x128xf32, #tpu.memory_space<vmem>>, vector<1x128xf32>
    %215 = vector.broadcast %214 : vector<1x128xf32> to vector<64x128xf32>
    %216 = arith.addf %213, %215 : vector<64x128xf32>
    %c0_141 = arith.constant 0 : index
    %c0_142 = arith.constant 0 : index
    %217 = vector.load %arg10[%c0_141, %c0_142] : memref<64x128xf32, #tpu.memory_space<vmem>>, vector<64x128xf32>
    tpu.vector_store %arg10[%c0_141, %c0_142], %216 {strides = array<i32>} : memref<64x128xf32, #tpu.memory_space<vmem>>, vector<64x128xf32>,
    %cst_143 = arith.constant 0.000000e+00 : f32
    %218 = vector.broadcast %cst_143 : f32 to vector<8x32xf32>
    %c0_144 = arith.constant 0 : index
    %c0_145 = arith.constant 0 : index
    %219 = vector.load %arg12[%c0_144, %c0_145] : memref<8x32xf32, #tpu.memory_space<vmem>>, vector<8x32xf32>
    tpu.vector_store %arg12[%c0_144, %c0_145], %218 {strides = array<i32>} : memref<8x32xf32, #tpu.memory_space<vmem>>, vector<8x32xf32>,
    %cst_146 = arith.constant 0.000000e+00 : f32
    %220 = vector.broadcast %cst_146 : f32 to vector<8x32xf32>
    %c0_147 = arith.constant 0 : index
    %c0_148 = arith.constant 0 : index
    %221 = vector.load %arg13[%c0_147, %c0_148] : memref<8x32xf32, #tpu.memory_space<vmem>>, vector<8x32xf32>
    tpu.vector_store %arg13[%c0_147, %c0_148], %220 {strides = array<i32>} : memref<8x32xf32, #tpu.memory_space<vmem>>, vector<8x32xf32>,
    %c0_149 = arith.constant 0 : index
    %c0_150 = arith.constant 0 : index
    %222 = vector.load %arg10[%c0_149, %c0_150] : memref<64x128xf32, #tpu.memory_space<vmem>>, vector<8x128xf32>
    %c0_151 = arith.constant 0 : index
    %c0_152 = arith.constant 0 : index
    %223 = vector.load %arg12[%c0_151, %c0_152] : memref<8x32xf32, #tpu.memory_space<vmem>>, vector<8x32xf32>
    %c0_153 = arith.constant 0 : index
    %c0_154 = arith.constant 0 : index
    %224 = vector.load %arg5[%c0_153, %c0_154] : memref<32x128xf32, #tpu.memory_space<vmem>>, vector<32x128xf32>
    %cst_155 = arith.constant dense<0.000000e+00> : vector<8x128xf32>
    %225 = tpu.matmul %223, %224, %cst_155 {dimension_numbers = #tpu.dot_dimension_numbers<[1], [0], [0], [1], [0, 0, 1, 1], [], []>} : vector<8x32xf32>, vector<32x128xf32>, vector<8x128xf32> -> vector<8x128xf32>
    %226 = arith.addf %222, %225 : vector<8x128xf32>
    %227 = vector.extract_strided_slice %226 {offsets = [0, 0], sizes = [8, 96], strides = [1, 1]} : vector<8x128xf32> to vector<8x96xf32>
    %228 = arith.negf %227 : vector<8x96xf32>
    %229 = math.exp %228 : vector<8x96xf32>
    %cst_156 = arith.constant 1.000000e+00 : f32
    %230 = vector.broadcast %cst_156 : f32 to vector<8x96xf32>
    %231 = arith.addf %230, %229 : vector<8x96xf32>
    %232 = arith.divf %230, %231 : vector<8x96xf32>
    %233 = vector.extract_strided_slice %226 {offsets = [0, 96], sizes = [8, 32], strides = [1, 1]} : vector<8x128xf32> to vector<8x32xf32>
    %234 = math.tanh %233 : vector<8x32xf32>
    %235 = vector.extract_strided_slice %232 {offsets = [0, 0], sizes = [8, 32], strides = [1, 1]} : vector<8x96xf32> to vector<8x32xf32>
    %236 = vector.extract_strided_slice %232 {offsets = [0, 32], sizes = [8, 32], strides = [1, 1]} : vector<8x96xf32> to vector<8x32xf32>
    %237 = vector.extract_strided_slice %232 {offsets = [0, 64], sizes = [8, 32], strides = [1, 1]} : vector<8x96xf32> to vector<8x32xf32>
    %c0_157 = arith.constant 0 : index
    %c0_158 = arith.constant 0 : index
    %238 = vector.load %arg13[%c0_157, %c0_158] : memref<8x32xf32, #tpu.memory_space<vmem>>, vector<8x32xf32>
    %239 = arith.mulf %236, %238 : vector<8x32xf32>
    %240 = arith.mulf %235, %234 : vector<8x32xf32>
    %241 = arith.addf %239, %240 : vector<8x32xf32>
    %242 = math.tanh %241 : vector<8x32xf32>
    %243 = arith.mulf %237, %242 : vector<8x32xf32>
    %c0_159 = arith.constant 0 : index
    %c0_160 = arith.constant 0 : index
    %244 = vector.load %arg13[%c0_159, %c0_160] : memref<8x32xf32, #tpu.memory_space<vmem>>, vector<8x32xf32>
    tpu.vector_store %arg13[%c0_159, %c0_160], %241 {strides = array<i32>} : memref<8x32xf32, #tpu.memory_space<vmem>>, vector<8x32xf32>,
    %c0_161 = arith.constant 0 : index
    %c0_162 = arith.constant 0 : index
    %245 = vector.load %arg12[%c0_161, %c0_162] : memref<8x32xf32, #tpu.memory_space<vmem>>, vector<8x32xf32>
    tpu.vector_store %arg12[%c0_161, %c0_162], %243 {strides = array<i32>} : memref<8x32xf32, #tpu.memory_space<vmem>>, vector<8x32xf32>,
    %c8_163 = arith.constant 8 : index
    %c0_164 = arith.constant 0 : index
    %246 = vector.load %arg10[%c8_163, %c0_164] : memref<64x128xf32, #tpu.memory_space<vmem>>, vector<8x128xf32>
    %c0_165 = arith.constant 0 : index
    %c0_166 = arith.constant 0 : index
    %247 = vector.load %arg12[%c0_165, %c0_166] : memref<8x32xf32, #tpu.memory_space<vmem>>, vector<8x32xf32>
    %c0_167 = arith.constant 0 : index
    %c0_168 = arith.constant 0 : index
    %248 = vector.load %arg5[%c0_167, %c0_168] : memref<32x128xf32, #tpu.memory_space<vmem>>, vector<32x128xf32>
    %cst_169 = arith.constant dense<0.000000e+00> : vector<8x128xf32>
    %249 = tpu.matmul %247, %248, %cst_169 {dimension_numbers = #tpu.dot_dimension_numbers<[1], [0], [0], [1], [0, 0, 1, 1], [], []>} : vector<8x32xf32>, vector<32x128xf32>, vector<8x128xf32> -> vector<8x128xf32>
    %250 = arith.addf %246, %249 : vector<8x128xf32>
    %251 = vector.extract_strided_slice %250 {offsets = [0, 0], sizes = [8, 96], strides = [1, 1]} : vector<8x128xf32> to vector<8x96xf32>
    %252 = arith.negf %251 : vector<8x96xf32>
    %253 = math.exp %252 : vector<8x96xf32>
    %cst_170 = arith.constant 1.000000e+00 : f32
    %254 = vector.broadcast %cst_170 : f32 to vector<8x96xf32>
    %255 = arith.addf %254, %253 : vector<8x96xf32>
    %256 = arith.divf %254, %255 : vector<8x96xf32>
    %257 = vector.extract_strided_slice %250 {offsets = [0, 96], sizes = [8, 32], strides = [1, 1]} : vector<8x128xf32> to vector<8x32xf32>
    %258 = math.tanh %257 : vector<8x32xf32>
    %259 = vector.extract_strided_slice %256 {offsets = [0, 0], sizes = [8, 32], strides = [1, 1]} : vector<8x96xf32> to vector<8x32xf32>
    %260 = vector.extract_strided_slice %256 {offsets = [0, 32], sizes = [8, 32], strides = [1, 1]} : vector<8x96xf32> to vector<8x32xf32>
    %261 = vector.extract_strided_slice %256 {offsets = [0, 64], sizes = [8, 32], strides = [1, 1]} : vector<8x96xf32> to vector<8x32xf32>
    %c0_171 = arith.constant 0 : index
    %c0_172 = arith.constant 0 : index
    %262 = vector.load %arg13[%c0_171, %c0_172] : memref<8x32xf32, #tpu.memory_space<vmem>>, vector<8x32xf32>
    %263 = arith.mulf %260, %262 : vector<8x32xf32>
    %264 = arith.mulf %259, %258 : vector<8x32xf32>
    %265 = arith.addf %263, %264 : vector<8x32xf32>
    %266 = math.tanh %265 : vector<8x32xf32>
    %267 = arith.mulf %261, %266 : vector<8x32xf32>
    %c0_173 = arith.constant 0 : index
    %c0_174 = arith.constant 0 : index
    %268 = vector.load %arg13[%c0_173, %c0_174] : memref<8x32xf32, #tpu.memory_space<vmem>>, vector<8x32xf32>
    tpu.vector_store %arg13[%c0_173, %c0_174], %265 {strides = array<i32>} : memref<8x32xf32, #tpu.memory_space<vmem>>, vector<8x32xf32>,
    %c0_175 = arith.constant 0 : index
    %c0_176 = arith.constant 0 : index
    %269 = vector.load %arg12[%c0_175, %c0_176] : memref<8x32xf32, #tpu.memory_space<vmem>>, vector<8x32xf32>
    tpu.vector_store %arg12[%c0_175, %c0_176], %267 {strides = array<i32>} : memref<8x32xf32, #tpu.memory_space<vmem>>, vector<8x32xf32>,
    %c16_177 = arith.constant 16 : index
    %c0_178 = arith.constant 0 : index
    %270 = vector.load %arg10[%c16_177, %c0_178] : memref<64x128xf32, #tpu.memory_space<vmem>>, vector<8x128xf32>
    %c0_179 = arith.constant 0 : index
    %c0_180 = arith.constant 0 : index
    %271 = vector.load %arg12[%c0_179, %c0_180] : memref<8x32xf32, #tpu.memory_space<vmem>>, vector<8x32xf32>
    %c0_181 = arith.constant 0 : index
    %c0_182 = arith.constant 0 : index
    %272 = vector.load %arg5[%c0_181, %c0_182] : memref<32x128xf32, #tpu.memory_space<vmem>>, vector<32x128xf32>
    %cst_183 = arith.constant dense<0.000000e+00> : vector<8x128xf32>
    %273 = tpu.matmul %271, %272, %cst_183 {dimension_numbers = #tpu.dot_dimension_numbers<[1], [0], [0], [1], [0, 0, 1, 1], [], []>} : vector<8x32xf32>, vector<32x128xf32>, vector<8x128xf32> -> vector<8x128xf32>
    %274 = arith.addf %270, %273 : vector<8x128xf32>
    %275 = vector.extract_strided_slice %274 {offsets = [0, 0], sizes = [8, 96], strides = [1, 1]} : vector<8x128xf32> to vector<8x96xf32>
    %276 = arith.negf %275 : vector<8x96xf32>
    %277 = math.exp %276 : vector<8x96xf32>
    %cst_184 = arith.constant 1.000000e+00 : f32
    %278 = vector.broadcast %cst_184 : f32 to vector<8x96xf32>
    %279 = arith.addf %278, %277 : vector<8x96xf32>
    %280 = arith.divf %278, %279 : vector<8x96xf32>
    %281 = vector.extract_strided_slice %274 {offsets = [0, 96], sizes = [8, 32], strides = [1, 1]} : vector<8x128xf32> to vector<8x32xf32>
    %282 = math.tanh %281 : vector<8x32xf32>
    %283 = vector.extract_strided_slice %280 {offsets = [0, 0], sizes = [8, 32], strides = [1, 1]} : vector<8x96xf32> to vector<8x32xf32>
    %284 = vector.extract_strided_slice %280 {offsets = [0, 32], sizes = [8, 32], strides = [1, 1]} : vector<8x96xf32> to vector<8x32xf32>
    %285 = vector.extract_strided_slice %280 {offsets = [0, 64], sizes = [8, 32], strides = [1, 1]} : vector<8x96xf32> to vector<8x32xf32>
    %c0_185 = arith.constant 0 : index
    %c0_186 = arith.constant 0 : index
    %286 = vector.load %arg13[%c0_185, %c0_186] : memref<8x32xf32, #tpu.memory_space<vmem>>, vector<8x32xf32>
    %287 = arith.mulf %284, %286 : vector<8x32xf32>
    %288 = arith.mulf %283, %282 : vector<8x32xf32>
    %289 = arith.addf %287, %288 : vector<8x32xf32>
    %290 = math.tanh %289 : vector<8x32xf32>
    %291 = arith.mulf %285, %290 : vector<8x32xf32>
    %c0_187 = arith.constant 0 : index
    %c0_188 = arith.constant 0 : index
    %292 = vector.load %arg13[%c0_187, %c0_188] : memref<8x32xf32, #tpu.memory_space<vmem>>, vector<8x32xf32>
    tpu.vector_store %arg13[%c0_187, %c0_188], %289 {strides = array<i32>} : memref<8x32xf32, #tpu.memory_space<vmem>>, vector<8x32xf32>,
    %c0_189 = arith.constant 0 : index
    %c0_190 = arith.constant 0 : index
    %293 = vector.load %arg12[%c0_189, %c0_190] : memref<8x32xf32, #tpu.memory_space<vmem>>, vector<8x32xf32>
    tpu.vector_store %arg12[%c0_189, %c0_190], %291 {strides = array<i32>} : memref<8x32xf32, #tpu.memory_space<vmem>>, vector<8x32xf32>,
    %c24_191 = arith.constant 24 : index
    %c0_192 = arith.constant 0 : index
    %294 = vector.load %arg10[%c24_191, %c0_192] : memref<64x128xf32, #tpu.memory_space<vmem>>, vector<8x128xf32>
    %c0_193 = arith.constant 0 : index
    %c0_194 = arith.constant 0 : index
    %295 = vector.load %arg12[%c0_193, %c0_194] : memref<8x32xf32, #tpu.memory_space<vmem>>, vector<8x32xf32>
    %c0_195 = arith.constant 0 : index
    %c0_196 = arith.constant 0 : index
    %296 = vector.load %arg5[%c0_195, %c0_196] : memref<32x128xf32, #tpu.memory_space<vmem>>, vector<32x128xf32>
    %cst_197 = arith.constant dense<0.000000e+00> : vector<8x128xf32>
    %297 = tpu.matmul %295, %296, %cst_197 {dimension_numbers = #tpu.dot_dimension_numbers<[1], [0], [0], [1], [0, 0, 1, 1], [], []>} : vector<8x32xf32>, vector<32x128xf32>, vector<8x128xf32> -> vector<8x128xf32>
    %298 = arith.addf %294, %297 : vector<8x128xf32>
    %299 = vector.extract_strided_slice %298 {offsets = [0, 0], sizes = [8, 96], strides = [1, 1]} : vector<8x128xf32> to vector<8x96xf32>
    %300 = arith.negf %299 : vector<8x96xf32>
    %301 = math.exp %300 : vector<8x96xf32>
    %cst_198 = arith.constant 1.000000e+00 : f32
    %302 = vector.broadcast %cst_198 : f32 to vector<8x96xf32>
    %303 = arith.addf %302, %301 : vector<8x96xf32>
    %304 = arith.divf %302, %303 : vector<8x96xf32>
    %305 = vector.extract_strided_slice %298 {offsets = [0, 96], sizes = [8, 32], strides = [1, 1]} : vector<8x128xf32> to vector<8x32xf32>
    %306 = math.tanh %305 : vector<8x32xf32>
    %307 = vector.extract_strided_slice %304 {offsets = [0, 0], sizes = [8, 32], strides = [1, 1]} : vector<8x96xf32> to vector<8x32xf32>
    %308 = vector.extract_strided_slice %304 {offsets = [0, 32], sizes = [8, 32], strides = [1, 1]} : vector<8x96xf32> to vector<8x32xf32>
    %309 = vector.extract_strided_slice %304 {offsets = [0, 64], sizes = [8, 32], strides = [1, 1]} : vector<8x96xf32> to vector<8x32xf32>
    %c0_199 = arith.constant 0 : index
    %c0_200 = arith.constant 0 : index
    %310 = vector.load %arg13[%c0_199, %c0_200] : memref<8x32xf32, #tpu.memory_space<vmem>>, vector<8x32xf32>
    %311 = arith.mulf %308, %310 : vector<8x32xf32>
    %312 = arith.mulf %307, %306 : vector<8x32xf32>
    %313 = arith.addf %311, %312 : vector<8x32xf32>
    %314 = math.tanh %313 : vector<8x32xf32>
    %315 = arith.mulf %309, %314 : vector<8x32xf32>
    %c0_201 = arith.constant 0 : index
    %c0_202 = arith.constant 0 : index
    %316 = vector.load %arg13[%c0_201, %c0_202] : memref<8x32xf32, #tpu.memory_space<vmem>>, vector<8x32xf32>
    tpu.vector_store %arg13[%c0_201, %c0_202], %313 {strides = array<i32>} : memref<8x32xf32, #tpu.memory_space<vmem>>, vector<8x32xf32>,
    %c0_203 = arith.constant 0 : index
    %c0_204 = arith.constant 0 : index
    %317 = vector.load %arg12[%c0_203, %c0_204] : memref<8x32xf32, #tpu.memory_space<vmem>>, vector<8x32xf32>
    tpu.vector_store %arg12[%c0_203, %c0_204], %315 {strides = array<i32>} : memref<8x32xf32, #tpu.memory_space<vmem>>, vector<8x32xf32>,
    %c32_205 = arith.constant 32 : index
    %c0_206 = arith.constant 0 : index
    %318 = vector.load %arg10[%c32_205, %c0_206] : memref<64x128xf32, #tpu.memory_space<vmem>>, vector<8x128xf32>
    %c0_207 = arith.constant 0 : index
    %c0_208 = arith.constant 0 : index
    %319 = vector.load %arg12[%c0_207, %c0_208] : memref<8x32xf32, #tpu.memory_space<vmem>>, vector<8x32xf32>
    %c0_209 = arith.constant 0 : index
    %c0_210 = arith.constant 0 : index
    %320 = vector.load %arg5[%c0_209, %c0_210] : memref<32x128xf32, #tpu.memory_space<vmem>>, vector<32x128xf32>
    %cst_211 = arith.constant dense<0.000000e+00> : vector<8x128xf32>
    %321 = tpu.matmul %319, %320, %cst_211 {dimension_numbers = #tpu.dot_dimension_numbers<[1], [0], [0], [1], [0, 0, 1, 1], [], []>} : vector<8x32xf32>, vector<32x128xf32>, vector<8x128xf32> -> vector<8x128xf32>
    %322 = arith.addf %318, %321 : vector<8x128xf32>
    %323 = vector.extract_strided_slice %322 {offsets = [0, 0], sizes = [8, 96], strides = [1, 1]} : vector<8x128xf32> to vector<8x96xf32>
    %324 = arith.negf %323 : vector<8x96xf32>
    %325 = math.exp %324 : vector<8x96xf32>
    %cst_212 = arith.constant 1.000000e+00 : f32
    %326 = vector.broadcast %cst_212 : f32 to vector<8x96xf32>
    %327 = arith.addf %326, %325 : vector<8x96xf32>
    %328 = arith.divf %326, %327 : vector<8x96xf32>
    %329 = vector.extract_strided_slice %322 {offsets = [0, 96], sizes = [8, 32], strides = [1, 1]} : vector<8x128xf32> to vector<8x32xf32>
    %330 = math.tanh %329 : vector<8x32xf32>
    %331 = vector.extract_strided_slice %328 {offsets = [0, 0], sizes = [8, 32], strides = [1, 1]} : vector<8x96xf32> to vector<8x32xf32>
    %332 = vector.extract_strided_slice %328 {offsets = [0, 32], sizes = [8, 32], strides = [1, 1]} : vector<8x96xf32> to vector<8x32xf32>
    %333 = vector.extract_strided_slice %328 {offsets = [0, 64], sizes = [8, 32], strides = [1, 1]} : vector<8x96xf32> to vector<8x32xf32>
    %c0_213 = arith.constant 0 : index
    %c0_214 = arith.constant 0 : index
    %334 = vector.load %arg13[%c0_213, %c0_214] : memref<8x32xf32, #tpu.memory_space<vmem>>, vector<8x32xf32>
    %335 = arith.mulf %332, %334 : vector<8x32xf32>
    %336 = arith.mulf %331, %330 : vector<8x32xf32>
    %337 = arith.addf %335, %336 : vector<8x32xf32>
    %338 = math.tanh %337 : vector<8x32xf32>
    %339 = arith.mulf %333, %338 : vector<8x32xf32>
    %c0_215 = arith.constant 0 : index
    %c0_216 = arith.constant 0 : index
    %340 = vector.load %arg13[%c0_215, %c0_216] : memref<8x32xf32, #tpu.memory_space<vmem>>, vector<8x32xf32>
    tpu.vector_store %arg13[%c0_215, %c0_216], %337 {strides = array<i32>} : memref<8x32xf32, #tpu.memory_space<vmem>>, vector<8x32xf32>,
    %c0_217 = arith.constant 0 : index
    %c0_218 = arith.constant 0 : index
    %341 = vector.load %arg12[%c0_217, %c0_218] : memref<8x32xf32, #tpu.memory_space<vmem>>, vector<8x32xf32>
    tpu.vector_store %arg12[%c0_217, %c0_218], %339 {strides = array<i32>} : memref<8x32xf32, #tpu.memory_space<vmem>>, vector<8x32xf32>,
    %c40_219 = arith.constant 40 : index
    %c0_220 = arith.constant 0 : index
    %342 = vector.load %arg10[%c40_219, %c0_220] : memref<64x128xf32, #tpu.memory_space<vmem>>, vector<8x128xf32>
    %c0_221 = arith.constant 0 : index
    %c0_222 = arith.constant 0 : index
    %343 = vector.load %arg12[%c0_221, %c0_222] : memref<8x32xf32, #tpu.memory_space<vmem>>, vector<8x32xf32>
    %c0_223 = arith.constant 0 : index
    %c0_224 = arith.constant 0 : index
    %344 = vector.load %arg5[%c0_223, %c0_224] : memref<32x128xf32, #tpu.memory_space<vmem>>, vector<32x128xf32>
    %cst_225 = arith.constant dense<0.000000e+00> : vector<8x128xf32>
    %345 = tpu.matmul %343, %344, %cst_225 {dimension_numbers = #tpu.dot_dimension_numbers<[1], [0], [0], [1], [0, 0, 1, 1], [], []>} : vector<8x32xf32>, vector<32x128xf32>, vector<8x128xf32> -> vector<8x128xf32>
    %346 = arith.addf %342, %345 : vector<8x128xf32>
    %347 = vector.extract_strided_slice %346 {offsets = [0, 0], sizes = [8, 96], strides = [1, 1]} : vector<8x128xf32> to vector<8x96xf32>
    %348 = arith.negf %347 : vector<8x96xf32>
    %349 = math.exp %348 : vector<8x96xf32>
    %cst_226 = arith.constant 1.000000e+00 : f32
    %350 = vector.broadcast %cst_226 : f32 to vector<8x96xf32>
    %351 = arith.addf %350, %349 : vector<8x96xf32>
    %352 = arith.divf %350, %351 : vector<8x96xf32>
    %353 = vector.extract_strided_slice %346 {offsets = [0, 96], sizes = [8, 32], strides = [1, 1]} : vector<8x128xf32> to vector<8x32xf32>
    %354 = math.tanh %353 : vector<8x32xf32>
    %355 = vector.extract_strided_slice %352 {offsets = [0, 0], sizes = [8, 32], strides = [1, 1]} : vector<8x96xf32> to vector<8x32xf32>
    %356 = vector.extract_strided_slice %352 {offsets = [0, 32], sizes = [8, 32], strides = [1, 1]} : vector<8x96xf32> to vector<8x32xf32>
    %357 = vector.extract_strided_slice %352 {offsets = [0, 64], sizes = [8, 32], strides = [1, 1]} : vector<8x96xf32> to vector<8x32xf32>
    %c0_227 = arith.constant 0 : index
    %c0_228 = arith.constant 0 : index
    %358 = vector.load %arg13[%c0_227, %c0_228] : memref<8x32xf32, #tpu.memory_space<vmem>>, vector<8x32xf32>
    %359 = arith.mulf %356, %358 : vector<8x32xf32>
    %360 = arith.mulf %355, %354 : vector<8x32xf32>
    %361 = arith.addf %359, %360 : vector<8x32xf32>
    %362 = math.tanh %361 : vector<8x32xf32>
    %363 = arith.mulf %357, %362 : vector<8x32xf32>
    %c0_229 = arith.constant 0 : index
    %c0_230 = arith.constant 0 : index
    %364 = vector.load %arg13[%c0_229, %c0_230] : memref<8x32xf32, #tpu.memory_space<vmem>>, vector<8x32xf32>
    tpu.vector_store %arg13[%c0_229, %c0_230], %361 {strides = array<i32>} : memref<8x32xf32, #tpu.memory_space<vmem>>, vector<8x32xf32>,
    %c0_231 = arith.constant 0 : index
    %c0_232 = arith.constant 0 : index
    %365 = vector.load %arg12[%c0_231, %c0_232] : memref<8x32xf32, #tpu.memory_space<vmem>>, vector<8x32xf32>
    tpu.vector_store %arg12[%c0_231, %c0_232], %363 {strides = array<i32>} : memref<8x32xf32, #tpu.memory_space<vmem>>, vector<8x32xf32>,
    %c48_233 = arith.constant 48 : index
    %c0_234 = arith.constant 0 : index
    %366 = vector.load %arg10[%c48_233, %c0_234] : memref<64x128xf32, #tpu.memory_space<vmem>>, vector<8x128xf32>
    %c0_235 = arith.constant 0 : index
    %c0_236 = arith.constant 0 : index
    %367 = vector.load %arg12[%c0_235, %c0_236] : memref<8x32xf32, #tpu.memory_space<vmem>>, vector<8x32xf32>
    %c0_237 = arith.constant 0 : index
    %c0_238 = arith.constant 0 : index
    %368 = vector.load %arg5[%c0_237, %c0_238] : memref<32x128xf32, #tpu.memory_space<vmem>>, vector<32x128xf32>
    %cst_239 = arith.constant dense<0.000000e+00> : vector<8x128xf32>
    %369 = tpu.matmul %367, %368, %cst_239 {dimension_numbers = #tpu.dot_dimension_numbers<[1], [0], [0], [1], [0, 0, 1, 1], [], []>} : vector<8x32xf32>, vector<32x128xf32>, vector<8x128xf32> -> vector<8x128xf32>
    %370 = arith.addf %366, %369 : vector<8x128xf32>
    %371 = vector.extract_strided_slice %370 {offsets = [0, 0], sizes = [8, 96], strides = [1, 1]} : vector<8x128xf32> to vector<8x96xf32>
    %372 = arith.negf %371 : vector<8x96xf32>
    %373 = math.exp %372 : vector<8x96xf32>
    %cst_240 = arith.constant 1.000000e+00 : f32
    %374 = vector.broadcast %cst_240 : f32 to vector<8x96xf32>
    %375 = arith.addf %374, %373 : vector<8x96xf32>
    %376 = arith.divf %374, %375 : vector<8x96xf32>
    %377 = vector.extract_strided_slice %370 {offsets = [0, 96], sizes = [8, 32], strides = [1, 1]} : vector<8x128xf32> to vector<8x32xf32>
    %378 = math.tanh %377 : vector<8x32xf32>
    %379 = vector.extract_strided_slice %376 {offsets = [0, 0], sizes = [8, 32], strides = [1, 1]} : vector<8x96xf32> to vector<8x32xf32>
    %380 = vector.extract_strided_slice %376 {offsets = [0, 32], sizes = [8, 32], strides = [1, 1]} : vector<8x96xf32> to vector<8x32xf32>
    %381 = vector.extract_strided_slice %376 {offsets = [0, 64], sizes = [8, 32], strides = [1, 1]} : vector<8x96xf32> to vector<8x32xf32>
    %c0_241 = arith.constant 0 : index
    %c0_242 = arith.constant 0 : index
    %382 = vector.load %arg13[%c0_241, %c0_242] : memref<8x32xf32, #tpu.memory_space<vmem>>, vector<8x32xf32>
    %383 = arith.mulf %380, %382 : vector<8x32xf32>
    %384 = arith.mulf %379, %378 : vector<8x32xf32>
    %385 = arith.addf %383, %384 : vector<8x32xf32>
    %386 = math.tanh %385 : vector<8x32xf32>
    %387 = arith.mulf %381, %386 : vector<8x32xf32>
    %c0_243 = arith.constant 0 : index
    %c0_244 = arith.constant 0 : index
    %388 = vector.load %arg13[%c0_243, %c0_244] : memref<8x32xf32, #tpu.memory_space<vmem>>, vector<8x32xf32>
    tpu.vector_store %arg13[%c0_243, %c0_244], %385 {strides = array<i32>} : memref<8x32xf32, #tpu.memory_space<vmem>>, vector<8x32xf32>,
    %c0_245 = arith.constant 0 : index
    %c0_246 = arith.constant 0 : index
    %389 = vector.load %arg12[%c0_245, %c0_246] : memref<8x32xf32, #tpu.memory_space<vmem>>, vector<8x32xf32>
    tpu.vector_store %arg12[%c0_245, %c0_246], %387 {strides = array<i32>} : memref<8x32xf32, #tpu.memory_space<vmem>>, vector<8x32xf32>,
    %c56_247 = arith.constant 56 : index
    %c0_248 = arith.constant 0 : index
    %390 = vector.load %arg10[%c56_247, %c0_248] : memref<64x128xf32, #tpu.memory_space<vmem>>, vector<8x128xf32>
    %c0_249 = arith.constant 0 : index
    %c0_250 = arith.constant 0 : index
    %391 = vector.load %arg12[%c0_249, %c0_250] : memref<8x32xf32, #tpu.memory_space<vmem>>, vector<8x32xf32>
    %c0_251 = arith.constant 0 : index
    %c0_252 = arith.constant 0 : index
    %392 = vector.load %arg5[%c0_251, %c0_252] : memref<32x128xf32, #tpu.memory_space<vmem>>, vector<32x128xf32>
    %cst_253 = arith.constant dense<0.000000e+00> : vector<8x128xf32>
    %393 = tpu.matmul %391, %392, %cst_253 {dimension_numbers = #tpu.dot_dimension_numbers<[1], [0], [0], [1], [0, 0, 1, 1], [], []>} : vector<8x32xf32>, vector<32x128xf32>, vector<8x128xf32> -> vector<8x128xf32>
    %394 = arith.addf %390, %393 : vector<8x128xf32>
    %395 = vector.extract_strided_slice %394 {offsets = [0, 0], sizes = [8, 96], strides = [1, 1]} : vector<8x128xf32> to vector<8x96xf32>
    %396 = arith.negf %395 : vector<8x96xf32>
    %397 = math.exp %396 : vector<8x96xf32>
    %cst_254 = arith.constant 1.000000e+00 : f32
    %398 = vector.broadcast %cst_254 : f32 to vector<8x96xf32>
    %399 = arith.addf %398, %397 : vector<8x96xf32>
    %400 = arith.divf %398, %399 : vector<8x96xf32>
    %401 = vector.extract_strided_slice %394 {offsets = [0, 96], sizes = [8, 32], strides = [1, 1]} : vector<8x128xf32> to vector<8x32xf32>
    %402 = math.tanh %401 : vector<8x32xf32>
    %403 = vector.extract_strided_slice %400 {offsets = [0, 0], sizes = [8, 32], strides = [1, 1]} : vector<8x96xf32> to vector<8x32xf32>
    %404 = vector.extract_strided_slice %400 {offsets = [0, 32], sizes = [8, 32], strides = [1, 1]} : vector<8x96xf32> to vector<8x32xf32>
    %405 = vector.extract_strided_slice %400 {offsets = [0, 64], sizes = [8, 32], strides = [1, 1]} : vector<8x96xf32> to vector<8x32xf32>
    %c0_255 = arith.constant 0 : index
    %c0_256 = arith.constant 0 : index
    %406 = vector.load %arg13[%c0_255, %c0_256] : memref<8x32xf32, #tpu.memory_space<vmem>>, vector<8x32xf32>
    %407 = arith.mulf %404, %406 : vector<8x32xf32>
    %408 = arith.mulf %403, %402 : vector<8x32xf32>
    %409 = arith.addf %407, %408 : vector<8x32xf32>
    %410 = math.tanh %409 : vector<8x32xf32>
    %411 = arith.mulf %405, %410 : vector<8x32xf32>
    %c0_257 = arith.constant 0 : index
    %c0_258 = arith.constant 0 : index
    %412 = vector.load %arg13[%c0_257, %c0_258] : memref<8x32xf32, #tpu.memory_space<vmem>>, vector<8x32xf32>
    tpu.vector_store %arg13[%c0_257, %c0_258], %409 {strides = array<i32>} : memref<8x32xf32, #tpu.memory_space<vmem>>, vector<8x32xf32>,
    %c0_259 = arith.constant 0 : index
    %c0_260 = arith.constant 0 : index
    %413 = vector.load %arg12[%c0_259, %c0_260] : memref<8x32xf32, #tpu.memory_space<vmem>>, vector<8x32xf32>
    tpu.vector_store %arg12[%c0_259, %c0_260], %411 {strides = array<i32>} : memref<8x32xf32, #tpu.memory_space<vmem>>, vector<8x32xf32>,
    %c0_261 = arith.constant 0 : index
    %c0_262 = arith.constant 0 : index
    %414 = vector.load %arg12[%c0_261, %c0_262] : memref<8x32xf32, #tpu.memory_space<vmem>>, vector<8x32xf32>
    %c0_263 = arith.constant 0 : index
    %c0_264 = arith.constant 0 : index
    %415 = vector.load %arg7[%c0_263, %c0_264] : memref<32x128xf32, #tpu.memory_space<vmem>>, vector<32x128xf32>
    %cst_265 = arith.constant dense<0.000000e+00> : vector<8x128xf32>
    %416 = tpu.matmul %414, %415, %cst_265 {dimension_numbers = #tpu.dot_dimension_numbers<[1], [0], [0], [1], [0, 0, 1, 1], [], []>} : vector<8x32xf32>, vector<32x128xf32>, vector<8x128xf32> -> vector<8x128xf32>
    %c0_266 = arith.constant 0 : index
    %c0_267 = arith.constant 0 : index
    %417 = vector.load %arg8[%c0_266, %c0_267] : memref<1x128xf32, #tpu.memory_space<vmem>>, vector<1x128xf32>
    %418 = vector.broadcast %417 : vector<1x128xf32> to vector<8x128xf32>
    %419 = arith.addf %416, %418 : vector<8x128xf32>
    %cst_268 = arith.constant 0.000000e+00 : f32
    %420 = vector.broadcast %cst_268 : f32 to vector<8x128xf32>
    %421 = arith.maximumf %419, %420 : vector<8x128xf32>
    %c0_269 = arith.constant 0 : index
    %c0_270 = arith.constant 0 : index
    %422 = vector.load %arg9[%c0_269, %c0_270] : memref<8x128xf32, #tpu.memory_space<vmem>>, vector<8x128xf32>
    tpu.vector_store %arg9[%c0_269, %c0_270], %421 {strides = array<i32>} : memref<8x128xf32, #tpu.memory_space<vmem>>, vector<8x128xf32>,
    return
  }
}

</mosaic_0001>

<bundles_post_ra>
// kernel: tpu_custom_call.1
= control target key start
LH: loop header
LB: loop body
LE: loop exit
PB: predicated region body
PF: predicated region fallthrough
CT: control target
= control target key end

     0   :  { %14 = vsyncpa [#allocation7], 0  ;;  %s3606_s0 = inlined_call_operand.vmem [shape: f32[64,16], index: 0, kind: input, shape index: {}]   ;;  %s3607_s1 = inlined_call_operand.hbm [shape: f32[16,128], index: 1, kind: input, shape index: {}]   ;;  %s3608_s2 = inlined_call_operand.vmem [shape: f32[32,128], index: 2, kind: input, shape index: {}]   ;;  %s3609_s3 = inlined_call_operand.vmem [shape: f32[1,128], index: 3, kind: input, shape index: {}]   ;;  %s3610_s4 = inlined_call_operand.vmem [shape: f32[32,128], index: 4, kind: input, shape index: {}]   ;;  %s3611_s5 = inlined_call_operand.vmem [shape: f32[32,128], index: 5, kind: input, shape index: {}]   ;;  %s3612_s6 = inlined_call_operand.vmem [shape: f32[1,128], index: 6, kind: input, shape index: {}]   ;;  %s3613_s7 = inlined_call_operand.hbm [shape: f32[32,128], index: 7, kind: input, shape index: {}]   ;;  %s3614_s8 = inlined_call_operand.vmem [shape: f32[1,128], index: 8, kind: input, shape index: {}]   ;;  %s3615_s9 = inlined_call_operand.hbm [shape: f32[8,128], index: 9, kind: output, shape index: {}]  }
   0x1   :  { %15 = vsyncpa [#allocation10], 0 }
   0x2   :  { %16 = vsyncpa [#allocation8], 0  ;;  %s3099_s30 = smov [#allocation6]   ;;  %s3027_s13 = scalar_lea.hbm %s3607_s1, 256 }
   0x3   :  { %s24_s10 = sshll.u32 %s3099_s30, 4  ;;  %p3028_p0 = scmp.ne.s32.totalorder %s3607_s1, %s3027_s13  ;;  %s25_s10 = int_to_ptr.vmem [resolvable:$true] %s24_s10 }
   0x4   :  { %p3031_p1 = scmp.lt.u32.totalorder %s3027_s13, %s3607_s1 }
   0x6   :  { %p3033_p2 = pnand %p3031_p1, %p3028_p0 }
   0x8   :  { %3036 = shalt.err (!%p3033_p2)
}
   0x9   :  { %s3037_s18 = scalar_lea.vmem %s25_s10, 256  ;;  %p3042_p4 = scmp.lt.s32.totalorder %s25_s10, %s25_s10 }
   0xa   :  { %p3038_p3 = scmp.ne.s32.totalorder %s25_s10, %s3037_s18  ;;  %p3043_p5 = scmp.lt.s32.totalorder %s3037_s18, %s3037_s18 }
   0xc   :  { %p3044_p6 = por %p3043_p5, %p3042_p4 }
   0xe   :  { %p3045_p7 = pnand %p3044_p6, %p3038_p3 }
  0x10   :  { %3048 = shalt.err (!%p3045_p7)
}
  0x11   :  { %s3100_s19 = smov 128   ;;  %s3101_s20 = smov 8  }
  0x12   :  { %30 = dma.hbm_to_vmem [thread:$0]  %s3607_s1, 256, %s25_s10, [#allocation7], %s3100_s19, %s3100_s19, %s3101_s20  }
  0x13   :  { %s3102_s23 = smov [#allocation9]   ;;  %s3049_s27 = scalar_lea.hbm %s3613_s7, 512 }
  0x14   :  { %s46_s24 = sshll.u32 %s3102_s23, 4  ;;  %p3050_p8 = scmp.ne.s32.totalorder %s3613_s7, %s3049_s27  ;;  %s47_s24 = int_to_ptr.vmem [resolvable:$true] %s46_s24 }
  0x15   :  { %p3053_p9 = scmp.lt.u32.totalorder %s3049_s27, %s3613_s7 }
  0x17   :  { %p3055_p10 = pnand %p3053_p9, %p3050_p8 }
  0x19   :  { %3058 = shalt.err (!%p3055_p10)
}
  0x1a   :  { %s3059_s12 = scalar_lea.vmem %s47_s24, 512  ;;  %p3064_p12 = scmp.lt.s32.totalorder %s47_s24, %s47_s24 }
  0x1b   :  { %p3060_p11 = scmp.ne.s32.totalorder %s47_s24, %s3059_s12  ;;  %p3065_p13 = scmp.lt.s32.totalorder %s3059_s12, %s3059_s12 }
  0x1d   :  { %p3066_p0 = por %p3065_p13, %p3064_p12 }
  0x1f   :  { %p3067_p1 = pnand %p3066_p0, %p3060_p11 }
  0x21   :  { %3070 = shalt.err (!%p3067_p1)
}
  0x22   :  { %52 = dma.hbm_to_vmem [thread:$0]  %s3613_s7, 512, %s47_s24, [#allocation10], %s3100_s19, %s3100_s19, %s3101_s20  }
  0x23   :  { %3093 = dma.done.wait [#allocation7], 256  }
  0x24   :  { %3094 = vsyncadd [#allocation7], 4294967040 }
  0x25   :  { %3095 = dma.done.wait [#allocation10], 512  }
  0x26   :  { %3096 = vsyncadd [#allocation10], 4294966784  ;;  %v3103_v0 = vmov 0.0|0.0   ;;  %vm3104_vm0 = vmmov 0   ;;  %v3105_v1 = vmov 0.0   ;;  %vm216_vm1 = vcmask 261120  }
  0x27   :  { %2778 = vmatprep.subr.bf16.mxu1 %v3103_v0  ;;  %2575 = vmatprep.mubr.msk.f32.mxu1 %vm3104_vm0, %v3105_v1  ;;  %217 = vst.msk [vmem:[#allocation4] sm:$0xff] %vm216_vm1, %v3105_v1  ;;  %218 = vst.msk [vmem:[#allocation5] sm:$0xff] %vm216_vm1, %v3105_v1  ;;  %vm78_vm2 = vcmask 130048   ;;  %v69_v2 = vld [vmem:[#allocation6] sm:$0xff]  ;;  %v70_v3 = vld [vmem:[#allocation6 + $0x8] sm:$0xff]  ;;  %s3106_s25 = smov 32  }
  0x28   :  { %v221_v4 = vld [vmem:[%s3608_s2] sm:$0xff]  ;;  %v2774_v5 = vpack.c.bf16 %v70_v3, %v69_v2  ;;  %v222_v6 = vld [vmem:[%s3608_s2 + $0x8] sm:$0xff]  ;;  %v223_v9 = vld [vmem:[%s3608_s2 + $0x10] sm:$0xff]  ;;  %s3108_s26 = smov 64  }
  0x29   :  { %v61_v7 = vld [vmem:[%s3606_s0] sm:$0xff]  ;;  %v3200_v8 = vpack.c.bf16 %v222_v6, %v221_v4  ;;  %v224_v10 = vld [vmem:[%s3608_s2 + $0x18] sm:$0xff]  ;;  %v62_v11 = vld [vmem:[%s3606_s0 + $0x8] sm:$0xff] }
  0x2a   :  { %2555 = vmatprep.mubr.msk.f32.mxu0 %vm78_vm2, %v61_v7  ;;  %2775 = vmatprep.subr.bf16.mxu0 %v2774_v5  ;;  %v3213_v12 = vpack.c.bf16 %v224_v10, %v223_v9  ;;  %v3234_v14 = vld [vmem:[%s3609_s3] ss:$0 sm:$0xff]  ;;  %s3107_s3 = smov 96   ;;  %v63_v56 = vld [vmem:[%s3606_s0 + $0x10] sm:$0xff]  ;;  %v64_v57 = vld [vmem:[%s3606_s0 + $0x18] sm:$0xff] }
  0x2b   :  { %2780 = vmatpush3.bf16.msra.mxu1 %v3200_v8  ;;  %2777 = vmatpush3.bf16.msra.mxu0 %v2774_v5  ;;  %v65_v58 = vld [vmem:[%s3606_s0 + $0x20] sm:$0xff]  ;;  %v66_v59 = vld [vmem:[%s3606_s0 + $0x28] sm:$0xff]  ;;  %v67_v60 = vld [vmem:[%s3606_s0 + $0x30] sm:$0xff] }
  0x2c   :  { %2781 = vmatprep.subr.bf16.mxu1 %v3103_v0  ;;  %2790 = vmatprep.subr.bf16.mxu0 %v3103_v0  ;;  %v68_v61 = vld [vmem:[%s3606_s0 + $0x38] sm:$0xff] }
  0x2e   :  { %2556 = vmatmul.mubr.msk.f32.vlgmr.msra.gmra.mrb[0].mxu0 %vm78_vm2, %v62_v11  ;;  %v220_v13 = vld [vmem:[#allocation4] sm:$0xff]  ;;  %v306_v22 = vld [vmem:[#allocation5] sm:$0xff] }
  0x2f   :  { %2783 = vmatpush3.bf16.msra.mxu1 %v3213_v12  ;;  %2792 = vmatpush3.bf16.msra.mxu0 %v3200_v8 }
  0x30   :  { %2784 = vmatprep.subr.bf16.mxu1 %v3103_v0  ;;  %2793 = vmatprep.subr.bf16.mxu0 %v3103_v0 }
  0x31   :  { %2558 = vmatprep.mubr.msk.f32.mxu0 %vm78_vm2, %v63_v56 }
  0x32   :  { %2576 = vmatmul.mubr.msk.f32.vlgmr.msra.gmra.mrb[0].mxu1 %vm216_vm1, %v220_v13  ;;  %2559 = vmatmul.mubr.msk.f32.gmra.mrb[2].mxu0 %vm78_vm2, %v64_v57 }
  0x33   :  { %2786 = vmatpush3.bf16.msra.mxu1 %v3200_v8  ;;  %2586 = vmatprep.mubr.msk.f32.mxu1 %vm3104_vm0, %v3105_v1 }
  0x34   :  { %2787 = vmatprep.subr.bf16.mxu1 %v3103_v0  ;;  %2795 = vmatpush3.bf16.msra.mxu0 %v3213_v12 }
  0x35   :  { %2802 = vmatprep.subr.bf16.mxu0 %v3103_v0  ;;  %2561 = vmatprep.mubr.msk.f32.mxu0 %vm78_vm2, %v65_v58 }
  0x36   :  { %2562 = vmatmul.mubr.msk.f32.gmra.mrb[4].mxu0 %vm78_vm2, %v66_v59 }
  0x37   :  { %2789 = vmatpush3.bf16.msra.mxu1 %v3213_v12  ;;  %2564 = vmatprep.mubr.msk.f32.mxu0 %vm78_vm2, %v67_v60 }
  0x38   :  { %2796 = vmatprep.subr.bf16.mxu1 %v3103_v0 }
  0x3a   :  { %2565 = vmatmul.mubr.msk.f32.gmra.mrb[6].mxu0 %vm78_vm2, %v68_v61 }
  0x3b   :  { %2597 = vmatprep.mubr.msk.f32.mxu0 %vm3104_vm0, %v3105_v1 }
 0x101   :  { %v2557_v15 = vpop.f32.mrb[0].mxu0 }
 0x102   :  { %v169_v16 = vpop.f32.mrb[1].mxu0  ;;  %v175_v40 = vadd.f32 %v2557_v15, %v3234_v14 }
 0x103   :  { %v170_v17 = vadd.f32 %v3234_v14, %v169_v16 }
 0x105   :  { %v294_v18 = vpop.f32.mrb[0].mxu1  ;;  %v2560_v4 = vpop.f32.mrb[2].mxu0 }
 0x106   :  { %v298_v19 = vadd.f32 %v294_v18, %v170_v17  ;;  %v2577_v20 = vpop.f32.mrb[1].mxu1  ;;  %v179_v5 = vpop.f32.mrb[3].mxu0 }
 0x107   :  { %v180_v15 = vadd.f32 %v3234_v14, %v179_v5 }
 0x108   :  { %2899 = vtanh.f32 %v298_v19  ;;  %v2402_v23 = vmul.f32 -1.442695, %v298_v19 }
 0x109   :  { %v3288_v6 = vpop.f32.mrb[4].mxu0 }
 0x10a   :  { %2901 = vpow2.f32 %v2402_v23  ;;  %v3290_v7 = vpop.f32.mrb[5].mxu0 }
 0x10b   :  { %v190_v59 = vadd.f32 %v3234_v14, %v3290_v7 }
 0x10d   :  { %v3301_v11 = vpop.f32.mrb[6].mxu0 }
 0x10e   :  { %v3303_v13 = vpop.f32.mrb[7].mxu0 }
 0x112   :  { %v2900_v21 = vpop.eup %2899 }
 0x113   :  { %313 = vrot.lane.b32.xlu0 %v2900_v21, %s3106_s25 }
 0x114   :  { %v2902_v24 = vpop.eup %2901 }
 0x115   :  { %v302_v25 = vadd.f32 1.0, %v2902_v24 }
 0x117   :  { %308 = vrot.lane.b32.xlu0 %v306_v22, %s3106_s25  ;;  %2903 = vrcp.f32 %v302_v25 }
 0x121   :  { %v2904_v26 = vpop.eup %2903 }
 0x185   :  { %v314_v27 = vpop.permute.xlu0 %313 }
 0x186   :  { %v316_v28 = vmul.f32 %v2904_v26, %v314_v27 }
 0x188   :  { %318 = vrot.lane.b32.xlu1 %v316_v28, %s3106_s25 }
 0x189   :  { %v309_v29 = vpop.permute.xlu0 %308 }
 0x18a   :  { %v311_v30 = vmul.f32 %v2904_v26, %v309_v29 }
 0x1fa   :  { %v319_v31 = vpop.permute.xlu1 %318 }
 0x1fb   :  { %v321_v32 = vadd.f32 %v319_v31, %v311_v30 }
 0x1fd   :  { %2905 = vtanh.f32 %v321_v32 }
 0x207   :  { %v2906_v33 = vpop.eup %2905 }
 0x208   :  { %324 = vrot.lane.b32.xlu1 %v2906_v33, %s3106_s25 }
 0x20c   :  { %329 = vrot.lane.b32.xlu1 %v321_v32, %s3107_s3 }
 0x27a   :  { %v325_v34 = vpop.permute.xlu1 %324 }
 0x27b   :  { %v327_v35 = vmul.f32 %v2904_v26, %v325_v34 }
 0x27d   :  { %334 = vrot.lane.b32.xlu0 %v327_v35, %s3108_s26 }
 0x27e   :  { %v330_v36 = vpop.permute.xlu1 %329 }
 0x27f   :  { %332 = vst.msk [vmem:[#allocation5] sm:$0xff] %vm216_vm1, %v330_v36 }
 0x286   :  { %v426_v37 = vld [vmem:[#allocation5] sm:$0xff] }
 0x287   :  { %428 = vrot.lane.b32.xlu1 %v426_v37, %s3106_s25  ;;  %v185_v37 = vadd.f32 %v2560_v4, %v3234_v14 }
 0x2ef   :  { %v335_v38 = vpop.permute.xlu0 %334 }
 0x2f0   :  { %337 = vst.msk [vmem:[#allocation4] sm:$0xff] %vm216_vm1, %v335_v38  ;;  %338 = vst.msk [vmem:[#allocation3] sm:$0xff] %vm216_vm1, %v335_v38 }
 0x2f7   :  { %v340_v39 = vld [vmem:[#allocation4] sm:$0xff] }
 0x2f8   :  { %2587 = vmatmul.mubr.msk.f32.vlgmr.msra.gmra.mrb[2].mxu1 %vm216_vm1, %v340_v39 }
 0x2f9   :  { %2798 = vmatpush3.bf16.msra.mxu1 %v3200_v8  ;;  %2608 = vmatprep.mubr.msk.f32.mxu1 %vm3104_vm0, %v3105_v1  ;;  %v429_v51 = vpop.permute.xlu1 %428 }
 0x2fa   :  { %2799 = vmatprep.subr.bf16.mxu1 %v3103_v0 }
 0x2fd   :  { %2801 = vmatpush3.bf16.msra.mxu1 %v3213_v12 }
 0x2fe   :  { %2808 = vmatprep.subr.bf16.mxu1 %v3103_v0 }
 0x3cb   :  { %v414_v41 = vpop.f32.mrb[2].mxu1 }
 0x3cc   :  { %v418_v42 = vadd.f32 %v414_v41, %v175_v40  ;;  %v2588_v43 = vpop.f32.mrb[3].mxu1 }
 0x3ce   :  { %2907 = vtanh.f32 %v418_v42  ;;  %v2404_v45 = vmul.f32 -1.442695, %v418_v42 }
 0x3d0   :  { %2909 = vpow2.f32 %v2404_v45 }
 0x3d8   :  { %v2908_v44 = vpop.eup %2907 }
 0x3d9   :  { %433 = vrot.lane.b32.xlu0 %v2908_v44, %s3106_s25 }
 0x3da   :  { %v2910_v46 = vpop.eup %2909 }
 0x3db   :  { %v422_v47 = vadd.f32 1.0, %v2910_v46 }
 0x3dd   :  { %2911 = vrcp.f32 %v422_v47 }
 0x3e7   :  { %v2912_v48 = vpop.eup %2911 }
 0x3e8   :  { %v431_v52 = vmul.f32 %v2912_v48, %v429_v51 }
 0x44b   :  { %v434_v49 = vpop.permute.xlu0 %433 }
 0x44c   :  { %v436_v50 = vmul.f32 %v2912_v48, %v434_v49 }
 0x44e   :  { %438 = vrot.lane.b32.xlu0 %v436_v50, %s3106_s25 }
 0x4c0   :  { %v439_v53 = vpop.permute.xlu0 %438 }
 0x4c1   :  { %v441_v54 = vadd.f32 %v439_v53, %v431_v52 }
 0x4c3   :  { %2913 = vtanh.f32 %v441_v54 }
 0x4cd   :  { %v2914_v55 = vpop.eup %2913 }
 0x4ce   :  { %444 = vrot.lane.b32.xlu1 %v2914_v55, %s3106_s25 }
 0x4d2   :  { %449 = vrot.lane.b32.xlu1 %v441_v54, %s3107_s3 }
 0x540   :  { %v445_v62 = vpop.permute.xlu1 %444 }
 0x541   :  { %v447_v63 = vmul.f32 %v2912_v48, %v445_v62 }
 0x543   :  { %454 = vrot.lane.b32.xlu0 %v447_v63, %s3108_s26 }
 0x544   :  { %v450_v2 = vpop.permute.xlu1 %449 }
 0x545   :  { %452 = vst.msk [vmem:[#allocation5] sm:$0xff] %vm216_vm1, %v450_v2 }
 0x54c   :  { %v546_v3 = vld [vmem:[#allocation5] sm:$0xff] }
 0x54d   :  { %548 = vrot.lane.b32.xlu1 %v546_v3, %s3106_s25 }
 0x5b5   :  { %v455_v9 = vpop.permute.xlu0 %454 }
 0x5b6   :  { %457 = vst.msk [vmem:[#allocation4] sm:$0xff] %vm216_vm1, %v455_v9  ;;  %458 = vst.msk [vmem:[#allocation3 + $0x8] sm:$0xff] %vm216_vm1, %v455_v9 }
 0x5bd   :  { %v460_v10 = vld [vmem:[#allocation4] sm:$0xff] }
 0x5be   :  { %2598 = vmatmul.mubr.msk.f32.vlgmr.msra.gmra.mrb[8].mxu0 %vm216_vm1, %v460_v10 }
 0x5bf   :  { %2804 = vmatpush3.bf16.msra.mxu0 %v3200_v8  ;;  %2619 = vmatprep.mubr.msk.f32.mxu0 %vm3104_vm0, %v3105_v1  ;;  %v549_v26 = vpop.permute.xlu1 %548 }
 0x5c0   :  { %2805 = vmatprep.subr.bf16.mxu0 %v3103_v0 }
 0x5c3   :  { %2807 = vmatpush3.bf16.msra.mxu0 %v3213_v12 }
 0x5c4   :  { %2814 = vmatprep.subr.bf16.mxu0 %v3103_v0 }
 0x691   :  { %v534_v16 = vpop.f32.mrb[8].mxu0 }
 0x692   :  { %v538_v17 = vadd.f32 %v534_v16, %v180_v15  ;;  %v2599_v18 = vpop.f32.mrb[9].mxu0 }
 0x694   :  { %2915 = vtanh.f32 %v538_v17  ;;  %v2406_v20 = vmul.f32 -1.442695, %v538_v17 }
 0x696   :  { %2917 = vpow2.f32 %v2406_v20 }
 0x69e   :  { %v2916_v19 = vpop.eup %2915 }
 0x69f   :  { %553 = vrot.lane.b32.xlu0 %v2916_v19, %s3106_s25 }
 0x6a0   :  { %v2918_v21 = vpop.eup %2917 }
 0x6a1   :  { %v542_v22 = vadd.f32 1.0, %v2918_v21 }
 0x6a3   :  { %2919 = vrcp.f32 %v542_v22 }
 0x6ad   :  { %v2920_v23 = vpop.eup %2919 }
 0x6ae   :  { %v551_v27 = vmul.f32 %v2920_v23, %v549_v26 }
 0x711   :  { %v554_v24 = vpop.permute.xlu0 %553 }
 0x712   :  { %v556_v25 = vmul.f32 %v2920_v23, %v554_v24 }
 0x714   :  { %558 = vrot.lane.b32.xlu0 %v556_v25, %s3106_s25  ;;  %v195_v25 = vadd.f32 %v3288_v6, %v3234_v14 }
 0x786   :  { %v559_v28 = vpop.permute.xlu0 %558 }
 0x787   :  { %v561_v29 = vadd.f32 %v559_v28, %v551_v27 }
 0x789   :  { %2921 = vtanh.f32 %v561_v29 }
 0x793   :  { %v2922_v30 = vpop.eup %2921 }
 0x794   :  { %564 = vrot.lane.b32.xlu1 %v2922_v30, %s3106_s25 }
 0x798   :  { %569 = vrot.lane.b32.xlu1 %v561_v29, %s3107_s3 }
 0x806   :  { %v565_v31 = vpop.permute.xlu1 %564 }
 0x807   :  { %v567_v32 = vmul.f32 %v2920_v23, %v565_v31 }
 0x809   :  { %574 = vrot.lane.b32.xlu0 %v567_v32, %s3108_s26 }
 0x80a   :  { %v570_v33 = vpop.permute.xlu1 %569 }
 0x80b   :  { %572 = vst.msk [vmem:[#allocation5] sm:$0xff] %vm216_vm1, %v570_v33 }
 0x812   :  { %v666_v34 = vld [vmem:[#allocation5] sm:$0xff] }
 0x813   :  { %668 = vrot.lane.b32.xlu1 %v666_v34, %s3106_s25 }
 0x87b   :  { %v575_v35 = vpop.permute.xlu0 %574 }
 0x87c   :  { %577 = vst.msk [vmem:[#allocation4] sm:$0xff] %vm216_vm1, %v575_v35  ;;  %578 = vst.msk [vmem:[#allocation3 + $0x10] sm:$0xff] %vm216_vm1, %v575_v35 }
 0x883   :  { %v580_v36 = vld [vmem:[#allocation4] sm:$0xff] }
 0x884   :  { %2609 = vmatmul.mubr.msk.f32.vlgmr.msra.gmra.mrb[4].mxu1 %vm216_vm1, %v580_v36 }
 0x885   :  { %2810 = vmatpush3.bf16.msra.mxu1 %v3200_v8  ;;  %2630 = vmatprep.mubr.msk.f32.mxu1 %vm3104_vm0, %v3105_v1  ;;  %v669_v48 = vpop.permute.xlu1 %668 }
 0x886   :  { %2811 = vmatprep.subr.bf16.mxu1 %v3103_v0 }
 0x889   :  { %2813 = vmatpush3.bf16.msra.mxu1 %v3213_v12 }
 0x88a   :  { %2820 = vmatprep.subr.bf16.mxu1 %v3103_v0 }
 0x957   :  { %v654_v38 = vpop.f32.mrb[4].mxu1 }
 0x958   :  { %v658_v39 = vadd.f32 %v654_v38, %v185_v37  ;;  %v2610_v40 = vpop.f32.mrb[5].mxu1  ;;  %v1187_v38 = vld [vmem:[%s3610_s4] sm:$0xff] }
 0x95a   :  { %2923 = vtanh.f32 %v658_v39  ;;  %v2408_v42 = vmul.f32 -1.442695, %v658_v39  ;;  %v1188_v39 = vld [vmem:[%s3610_s4 + $0x8] sm:$0xff] }
 0x95b   :  { %v2826_v40 = vpack.c.bf16 %v1188_v39, %v1187_v38  ;;  %v1339_v39 = vld [vmem:[%s3611_s5] sm:$0xff] }
 0x95c   :  { %2925 = vpow2.f32 %v2408_v42 }
 0x964   :  { %v2924_v41 = vpop.eup %2923 }
 0x965   :  { %673 = vrot.lane.b32.xlu0 %v2924_v41, %s3106_s25 }
 0x966   :  { %v2926_v43 = vpop.eup %2925 }
 0x967   :  { %v662_v44 = vadd.f32 1.0, %v2926_v43 }
 0x969   :  { %2927 = vrcp.f32 %v662_v44 }
 0x973   :  { %v2928_v45 = vpop.eup %2927 }
 0x974   :  { %v671_v49 = vmul.f32 %v2928_v45, %v669_v48 }
 0x9d7   :  { %v674_v46 = vpop.permute.xlu0 %673 }
 0x9d8   :  { %v676_v47 = vmul.f32 %v2928_v45, %v674_v46  ;;  %v1189_v46 = vld [vmem:[%s3610_s4 + $0x10] sm:$0xff] }
 0x9da   :  { %678 = vrot.lane.b32.xlu0 %v676_v47, %s3106_s25  ;;  %v1190_v47 = vld [vmem:[%s3610_s4 + $0x18] sm:$0xff] }
 0x9db   :  { %v2830_v48 = vpack.c.bf16 %v1190_v47, %v1189_v46 }
 0xa4c   :  { %v679_v50 = vpop.permute.xlu0 %678 }
 0xa4d   :  { %v681_v51 = vadd.f32 %v679_v50, %v671_v49  ;;  %v1179_v50 = vld [vmem:[#allocation3] sm:$0xff] }
 0xa4f   :  { %2929 = vtanh.f32 %v681_v51 }
 0xa59   :  { %v2930_v52 = vpop.eup %2929 }
 0xa5a   :  { %684 = vrot.lane.b32.xlu1 %v2930_v52, %s3106_s25  ;;  %v1181_v52 = vld [vmem:[#allocation3 + $0x10] sm:$0xff] }
 0xa5e   :  { %689 = vrot.lane.b32.xlu1 %v681_v51, %s3107_s3  ;;  %v1180_v51 = vld [vmem:[#allocation3 + $0x8] sm:$0xff] }
 0xacc   :  { %v685_v53 = vpop.permute.xlu1 %684 }
 0xacd   :  { %v687_v54 = vmul.f32 %v2928_v45, %v685_v53 }
 0xacf   :  { %694 = vrot.lane.b32.xlu0 %v687_v54, %s3108_s26 }
 0xad0   :  { %v690_v55 = vpop.permute.xlu1 %689 }
 0xad1   :  { %692 = vst.msk [vmem:[#allocation5] sm:$0xff] %vm216_vm1, %v690_v55 }
 0xad8   :  { %v786_v56 = vld [vmem:[#allocation5] sm:$0xff] }
 0xad9   :  { %788 = vrot.lane.b32.xlu1 %v786_v56, %s3106_s25  ;;  %v200_v56 = vadd.f32 %v3234_v14, %v3303_v13 }
 0xb41   :  { %v695_v57 = vpop.permute.xlu0 %694 }
 0xb42   :  { %697 = vst.msk [vmem:[#allocation4] sm:$0xff] %vm216_vm1, %v695_v57  ;;  %698 = vst.msk [vmem:[#allocation3 + $0x18] sm:$0xff] %vm216_vm1, %v695_v57 }
 0xb49   :  { %v700_v58 = vld [vmem:[#allocation4] sm:$0xff]  ;;  %v1182_v53 = vld [vmem:[#allocation3 + $0x18] sm:$0xff] }
 0xb4a   :  { %2620 = vmatmul.mubr.msk.f32.vlgmr.msra.gmra.mrb[10].mxu0 %vm216_vm1, %v700_v58 }
 0xb4b   :  { %2816 = vmatpush3.bf16.msra.mxu0 %v3200_v8  ;;  %2641 = vmatprep.mubr.msk.f32.mxu0 %vm3104_vm0, %v3105_v1  ;;  %v789_v15 = vpop.permute.xlu1 %788 }
 0xb4c   :  { %2817 = vmatprep.subr.bf16.mxu0 %v3103_v0 }
 0xb4f   :  { %2819 = vmatpush3.bf16.msra.mxu0 %v3213_v12 }
 0xb50   :  { %2827 = vmatprep.subr.bf16.mxu0 %v2826_v40 }
 0xc1d   :  { %v774_v60 = vpop.f32.mrb[10].mxu0 }
 0xc1e   :  { %v778_v61 = vadd.f32 %v774_v60, %v190_v59  ;;  %v2621_v62 = vpop.f32.mrb[11].mxu0 }
 0xc20   :  { %2931 = vtanh.f32 %v778_v61  ;;  %v2410_v2 = vmul.f32 -1.442695, %v778_v61 }
 0xc22   :  { %2933 = vpow2.f32 %v2410_v2 }
 0xc2a   :  { %v2932_v63 = vpop.eup %2931 }
 0xc2b   :  { %793 = vrot.lane.b32.xlu0 %v2932_v63, %s3106_s25 }
 0xc2c   :  { %v2934_v3 = vpop.eup %2933 }
 0xc2d   :  { %v782_v4 = vadd.f32 1.0, %v2934_v3 }
 0xc2f   :  { %2935 = vrcp.f32 %v782_v4 }
 0xc39   :  { %v2936_v5 = vpop.eup %2935 }
 0xc3a   :  { %v791_v16 = vmul.f32 %v2936_v5, %v789_v15 }
 0xc9d   :  { %v794_v9 = vpop.permute.xlu0 %793 }
 0xc9e   :  { %v796_v10 = vmul.f32 %v2936_v5, %v794_v9 }
 0xca0   :  { %798 = vrot.lane.b32.xlu0 %v796_v10, %s3106_s25 }
 0xd12   :  { %v799_v7 = vpop.permute.xlu0 %798 }
 0xd13   :  { %v801_v17 = vadd.f32 %v799_v7, %v791_v16 }
 0xd15   :  { %2937 = vtanh.f32 %v801_v17 }
 0xd1f   :  { %v2938_v18 = vpop.eup %2937 }
 0xd20   :  { %804 = vrot.lane.b32.xlu1 %v2938_v18, %s3106_s25 }
 0xd24   :  { %809 = vrot.lane.b32.xlu1 %v801_v17, %s3107_s3 }
 0xd92   :  { %v805_v19 = vpop.permute.xlu1 %804 }
 0xd93   :  { %v807_v20 = vmul.f32 %v2936_v5, %v805_v19 }
 0xd95   :  { %814 = vrot.lane.b32.xlu0 %v807_v20, %s3108_s26 }
 0xd96   :  { %v810_v21 = vpop.permute.xlu1 %809 }
 0xd97   :  { %812 = vst.msk [vmem:[#allocation5] sm:$0xff] %vm216_vm1, %v810_v21 }
 0xd9e   :  { %v906_v22 = vld [vmem:[#allocation5] sm:$0xff] }
 0xd9f   :  { %908 = vrot.lane.b32.xlu1 %v906_v22, %s3106_s25 }
 0xe07   :  { %v815_v23 = vpop.permute.xlu0 %814 }
 0xe08   :  { %817 = vst.msk [vmem:[#allocation4] sm:$0xff] %vm216_vm1, %v815_v23  ;;  %818 = vst.msk [vmem:[#allocation3 + $0x20] sm:$0xff] %vm216_vm1, %v815_v23 }
 0xe0f   :  { %v820_v24 = vld [vmem:[#allocation4] sm:$0xff] }
 0xe10   :  { %2631 = vmatmul.mubr.msk.f32.vlgmr.msra.gmra.mrb[6].mxu1 %vm216_vm1, %v820_v24  ;;  %v1183_v54 = vld [vmem:[#allocation3 + $0x20] sm:$0xff] }
 0xe11   :  { %2822 = vmatpush3.bf16.msra.mxu1 %v3200_v8  ;;  %2652 = vmatprep.mubr.msk.f32.mxu1 %vm3104_vm0, %v3105_v1  ;;  %v909_v34 = vpop.permute.xlu1 %908 }
 0xe12   :  { %2823 = vmatprep.subr.bf16.mxu1 %v3103_v0 }
 0xe15   :  { %2825 = vmatpush3.bf16.msra.mxu1 %v3213_v12 }
 0xe16   :  { %2834 = vmatprep.subr.bf16.mxu1 %v3103_v0 }
 0xee3   :  { %v894_v26 = vpop.f32.mrb[6].mxu1 }
 0xee4   :  { %v898_v27 = vadd.f32 %v894_v26, %v195_v25  ;;  %v2632_v28 = vpop.f32.mrb[7].mxu1 }
 0xee5   :  { %v205_v28 = vadd.f32 %v3301_v11, %v3234_v14 }
 0xee6   :  { %2939 = vtanh.f32 %v898_v27  ;;  %v2412_v8 = vmul.f32 -1.442695, %v898_v27 }
 0xee8   :  { %2941 = vpow2.f32 %v2412_v8 }
 0xef0   :  { %v2940_v29 = vpop.eup %2939 }
 0xef1   :  { %913 = vrot.lane.b32.xlu0 %v2940_v29, %s3106_s25 }
 0xef2   :  { %v2942_v30 = vpop.eup %2941 }
 0xef3   :  { %v902_v31 = vadd.f32 1.0, %v2942_v30 }
 0xef5   :  { %2943 = vrcp.f32 %v902_v31 }
 0xeff   :  { %v2944_v32 = vpop.eup %2943 }
 0xf00   :  { %v911_v35 = vmul.f32 %v2944_v32, %v909_v34 }
 0xf63   :  { %v914_v33 = vpop.permute.xlu0 %913 }
 0xf64   :  { %v916_v12 = vmul.f32 %v2944_v32, %v914_v33 }
 0xf66   :  { %918 = vrot.lane.b32.xlu0 %v916_v12, %s3106_s25 }
 0xfd8   :  { %v919_v6 = vpop.permute.xlu0 %918 }
 0xfd9   :  { %v921_v36 = vadd.f32 %v919_v6, %v911_v35 }
 0xfdb   :  { %2945 = vtanh.f32 %v921_v36 }
 0xfe5   :  { %v2946_v37 = vpop.eup %2945 }
 0xfe6   :  { %924 = vrot.lane.b32.xlu1 %v2946_v37, %s3106_s25 }
 0xfea   :  { %929 = vrot.lane.b32.xlu1 %v921_v36, %s3107_s3 }
0x1058   :  { %v925_v41 = vpop.permute.xlu1 %924 }
0x1059   :  { %v927_v42 = vmul.f32 %v2944_v32, %v925_v41 }
0x105b   :  { %934 = vrot.lane.b32.xlu0 %v927_v42, %s3108_s26  ;;  %v1341_v42 = vld [vmem:[%s3611_s5 + $0x10] sm:$0xff] }
0x105c   :  { %v930_v43 = vpop.permute.xlu1 %929 }
0x105d   :  { %932 = vst.msk [vmem:[#allocation5] sm:$0xff] %vm216_vm1, %v930_v43  ;;  %v1342_v43 = vld [vmem:[%s3611_s5 + $0x18] sm:$0xff] }
0x1064   :  { %v1026_v44 = vld [vmem:[#allocation5] sm:$0xff] }
0x1065   :  { %1028 = vrot.lane.b32.xlu1 %v1026_v44, %s3106_s25  ;;  %v3435_v44 = vpack.c.bf16 %v1342_v43, %v1341_v42 }
0x10cd   :  { %v935_v45 = vpop.permute.xlu0 %934 }
0x10ce   :  { %937 = vst.msk [vmem:[#allocation4] sm:$0xff] %vm216_vm1, %v935_v45  ;;  %938 = vst.msk [vmem:[#allocation3 + $0x28] sm:$0xff] %vm216_vm1, %v935_v45 }
0x10d5   :  { %v940_v49 = vld [vmem:[#allocation4] sm:$0xff]  ;;  %v1184_v55 = vld [vmem:[#allocation3 + $0x28] sm:$0xff] }
0x10d6   :  { %2642 = vmatmul.mubr.msk.f32.vlgmr.msra.gmra.mrb[12].mxu0 %vm216_vm1, %v940_v49 }
0x10d7   :  { %2829 = vmatpush3.bf16.msra.mxu0 %v2826_v40  ;;  %2663 = vmatprep.mubr.msk.f32.mxu0 %vm216_vm1, %v1179_v50  ;;  %v1029_v7 = vpop.permute.xlu1 %1028  ;;  %v1340_v40 = vld [vmem:[%s3611_s5 + $0x8] sm:$0xff] }
0x10d8   :  { %2831 = vmatprep.subr.bf16.mxu0 %v2830_v48  ;;  %v3426_v41 = vpack.c.bf16 %v1340_v40, %v1339_v39 }
0x10db   :  { %2833 = vmatpush3.bf16.msra.mxu0 %v2830_v48 }
0x10dc   :  { %2846 = vmatprep.subr.bf16.mxu0 %v3103_v0 }
0x10de   :  { %2664 = vmatmul.mubr.msk.f32.vlgmr.msra.gmra.mrb[14].mxu0 %vm216_vm1, %v1180_v51 }
0x10df   :  { %2666 = vmatprep.mubr.msk.f32.mxu0 %vm216_vm1, %v1181_v52  ;;  %2848 = vmatpush3.bf16.msra.mxu0 %v3426_v41  ;;  %v3466_v52 = vld [vmem:[%s3612_s6] ss:$0 sm:$0xff] }
0x10e0   :  { %2849 = vmatprep.subr.bf16.mxu0 %v3103_v0 }
0x10e2   :  { %2667 = vmatmul.mubr.msk.f32.gmra.mrb[16].mxu0 %vm216_vm1, %v1182_v53 }
0x10e3   :  { %2669 = vmatprep.mubr.msk.f32.mxu0 %vm216_vm1, %v1183_v54  ;;  %2851 = vmatpush3.bf16.msra.mxu0 %v3435_v44 }
0x10e4   :  { %2858 = vmatprep.subr.bf16.mxu0 %v3103_v0 }
0x10e6   :  { %2670 = vmatmul.mubr.msk.f32.gmra.mrb[18].mxu0 %vm216_vm1, %v1184_v55 }
0x11a9   :  { %v1014_v57 = vpop.f32.mrb[12].mxu0 }
0x11aa   :  { %v1018_v58 = vadd.f32 %v1014_v57, %v200_v56  ;;  %v2643_v59 = vpop.f32.mrb[13].mxu0 }
0x11ac   :  { %2947 = vtanh.f32 %v1018_v58  ;;  %v2414_v13 = vmul.f32 -1.442695, %v1018_v58 }
0x11ae   :  { %2949 = vpow2.f32 %v2414_v13 }
0x11b1   :  { %v3389_v60 = vpop.f32.mrb[14].mxu0 }
0x11b2   :  { %v3391_v61 = vpop.f32.mrb[15].mxu0 }
0x11b3   :  { %v1289_v53 = vadd.f32 %v3466_v52, %v3391_v61 }
0x11b5   :  { %v3393_v62 = vpop.f32.mrb[16].mxu0 }
0x11b6   :  { %v2948_v63 = vpop.eup %2947  ;;  %v3395_v2 = vpop.f32.mrb[17].mxu0 }
0x11b7   :  { %1033 = vrot.lane.b32.xlu0 %v2948_v63, %s3106_s25  ;;  %v1299_v42 = vadd.f32 %v3466_v52, %v3395_v2 }
0x11b8   :  { %v2950_v5 = vpop.eup %2949 }
0x11b9   :  { %v3398_v3 = vpop.f32.mrb[18].mxu0  ;;  %v1022_v9 = vadd.f32 1.0, %v2950_v5 }
0x11ba   :  { %v3400_v4 = vpop.f32.mrb[19].mxu0 }
0x11bb   :  { %2951 = vrcp.f32 %v1022_v9 }
0x11c5   :  { %v2952_v10 = vpop.eup %2951 }
0x11c6   :  { %v1031_v17 = vmul.f32 %v2952_v10, %v1029_v7 }
0x1229   :  { %v1034_v15 = vpop.permute.xlu0 %1033 }
0x122a   :  { %v1036_v16 = vmul.f32 %v2952_v10, %v1034_v15 }
0x122c   :  { %1038 = vrot.lane.b32.xlu0 %v1036_v16, %s3106_s25 }
0x129e   :  { %v1039_v18 = vpop.permute.xlu0 %1038 }
0x129f   :  { %v1041_v19 = vadd.f32 %v1039_v18, %v1031_v17 }
0x12a1   :  { %2953 = vtanh.f32 %v1041_v19 }
0x12ab   :  { %v2954_v20 = vpop.eup %2953 }
0x12ac   :  { %1044 = vrot.lane.b32.xlu1 %v2954_v20, %s3106_s25 }
0x12b0   :  { %1049 = vrot.lane.b32.xlu1 %v1041_v19, %s3107_s3 }
0x131e   :  { %v1045_v21 = vpop.permute.xlu1 %1044 }
0x131f   :  { %v1047_v22 = vmul.f32 %v2952_v10, %v1045_v21 }
0x1321   :  { %1054 = vrot.lane.b32.xlu0 %v1047_v22, %s3108_s26 }
0x1322   :  { %v1050_v23 = vpop.permute.xlu1 %1049 }
0x1323   :  { %1052 = vst.msk [vmem:[#allocation5] sm:$0xff] %vm216_vm1, %v1050_v23 }
0x132a   :  { %v1146_v24 = vld [vmem:[#allocation5] sm:$0xff] }
0x132b   :  { %1148 = vrot.lane.b32.xlu1 %v1146_v24, %s3106_s25 }
0x1393   :  { %v1055_v25 = vpop.permute.xlu0 %1054 }
0x1394   :  { %1057 = vst.msk [vmem:[#allocation4] sm:$0xff] %vm216_vm1, %v1055_v25  ;;  %1058 = vst.msk [vmem:[#allocation3 + $0x30] sm:$0xff] %vm216_vm1, %v1055_v25  ;;  %v1294_v25 = vadd.f32 %v3389_v60, %v3466_v52 }
0x139b   :  { %v1060_v26 = vld [vmem:[#allocation4] sm:$0xff]  ;;  %v1185_v27 = vld [vmem:[#allocation3 + $0x30] sm:$0xff] }
0x139c   :  { %2653 = vmatmul.mubr.msk.f32.vlgmr.msra.gmra.mrb[8].mxu1 %vm216_vm1, %v1060_v26  ;;  %2672 = vmatprep.mubr.msk.f32.mxu0 %vm216_vm1, %v1185_v27 }
0x139d   :  { %2683 = vmatprep.mubr.msk.f32.mxu1 %vm3104_vm0, %v3105_v1  ;;  %v1149_v36 = vpop.permute.xlu1 %1148  ;;  %2836 = vmatpush3.bf16.msra.mxu1 %v3426_v41 }
0x139e   :  { %2837 = vmatprep.subr.bf16.mxu1 %v3103_v0 }
0x13a1   :  { %2839 = vmatpush3.bf16.msra.mxu1 %v3435_v44 }
0x13a2   :  { %2840 = vmatprep.subr.bf16.mxu1 %v3103_v0 }
0x146f   :  { %v1134_v29 = vpop.f32.mrb[8].mxu1 }
0x1470   :  { %v1138_v8 = vadd.f32 %v1134_v29, %v205_v28  ;;  %v2654_v30 = vpop.f32.mrb[9].mxu1 }
0x1472   :  { %2955 = vtanh.f32 %v1138_v8  ;;  %v2416_v32 = vmul.f32 -1.442695, %v1138_v8 }
0x1474   :  { %2957 = vpow2.f32 %v2416_v32 }
0x147c   :  { %v2956_v31 = vpop.eup %2955 }
0x147d   :  { %1153 = vrot.lane.b32.xlu0 %v2956_v31, %s3106_s25 }
0x147e   :  { %v2958_v33 = vpop.eup %2957 }
0x147f   :  { %v1142_v12 = vadd.f32 1.0, %v2958_v33 }
0x1481   :  { %2959 = vrcp.f32 %v1142_v12 }
0x148b   :  { %v2960_v34 = vpop.eup %2959 }
0x148c   :  { %v1151_v37 = vmul.f32 %v2960_v34, %v1149_v36 }
0x14ef   :  { %v1154_v35 = vpop.permute.xlu0 %1153 }
0x14f0   :  { %v1156_v6 = vmul.f32 %v2960_v34, %v1154_v35 }
0x14f2   :  { %1158 = vrot.lane.b32.xlu0 %v1156_v6, %s3106_s25 }
0x1564   :  { %v1159_v14 = vpop.permute.xlu0 %1158 }
0x1565   :  { %v1161_v11 = vadd.f32 %v1159_v14, %v1151_v37 }
0x1567   :  { %2961 = vtanh.f32 %v1161_v11 }
0x1571   :  { %v2962_v38 = vpop.eup %2961 }
0x1572   :  { %1164 = vrot.lane.b32.xlu1 %v2962_v38, %s3106_s25 }
0x1576   :  { %1169 = vrot.lane.b32.xlu1 %v1161_v11, %s3107_s3 }
0x15e4   :  { %v1165_v45 = vpop.permute.xlu1 %1164 }
0x15e5   :  { %v1167_v46 = vmul.f32 %v2960_v34, %v1165_v45 }
0x15e7   :  { %1174 = vrot.lane.b32.xlu0 %v1167_v46, %s3108_s26 }
0x15e8   :  { %v1170_v47 = vpop.permute.xlu1 %1169 }
0x15e9   :  { %1172 = vst.msk [vmem:[#allocation5] sm:$0xff] %vm216_vm1, %v1170_v47 }
0x15ea   :  { %1336 = vst.msk [vmem:[#allocation5] sm:$0xff] %vm216_vm1, %v3105_v1 }
0x15f1   :  { %v1424_v48 = vld [vmem:[#allocation5] sm:$0xff] }
0x15f2   :  { %1426 = vrot.lane.b32.xlu1 %v1424_v48, %s3106_s25 }
0x1659   :  { %v1175_v49 = vpop.permute.xlu0 %1174 }
0x165a   :  { %1177 = vst.msk [vmem:[#allocation4] sm:$0xff] %vm216_vm1, %v1175_v49  ;;  %1178 = vst.msk [vmem:[#allocation3 + $0x38] sm:$0xff] %vm216_vm1, %v1175_v49 }
0x165b   :  { %1335 = vst.msk [vmem:[#allocation4] sm:$0xff] %vm216_vm1, %v3105_v1 }
0x1661   :  { %v1186_v50 = vld [vmem:[#allocation3 + $0x38] sm:$0xff] }
0x1662   :  { %2673 = vmatmul.mubr.msk.f32.gmra.mrb[20].mxu0 %vm216_vm1, %v1186_v50  ;;  %v1338_v51 = vld [vmem:[#allocation4] sm:$0xff] }
0x1663   :  { %2684 = vmatmul.mubr.msk.f32.vlgmr.msra.gmra.mrb[10].mxu1 %vm216_vm1, %v1338_v51  ;;  %2705 = vmatprep.mubr.msk.f32.mxu0 %vm3104_vm0, %v3105_v1 }
0x1664   :  { %2842 = vmatpush3.bf16.msra.mxu1 %v3426_v41  ;;  %2694 = vmatprep.mubr.msk.f32.mxu1 %vm3104_vm0, %v3105_v1  ;;  %v1427_v61 = vpop.permute.xlu1 %1426 }
0x1665   :  { %2843 = vmatprep.subr.bf16.mxu1 %v3103_v0 }
0x1668   :  { %2845 = vmatpush3.bf16.msra.mxu1 %v3435_v44 }
0x1669   :  { %2852 = vmatprep.subr.bf16.mxu1 %v3103_v0 }
0x1735   :  { %v3470_v54 = vpop.f32.mrb[20].mxu0 }
0x1736   :  { %v3472_v55 = vpop.f32.mrb[21].mxu0  ;;  %v1412_v56 = vpop.f32.mrb[10].mxu1 }
0x1737   :  { %v1416_v57 = vadd.f32 %v1412_v56, %v1289_v53  ;;  %v2685_v58 = vpop.f32.mrb[11].mxu1 }
0x1739   :  { %2963 = vtanh.f32 %v1416_v57  ;;  %v2427_v63 = vmul.f32 -1.442695, %v1416_v57 }
0x173b   :  { %2965 = vpow2.f32 %v2427_v63 }
0x1743   :  { %v2964_v59 = vpop.eup %2963 }
0x1744   :  { %1431 = vrot.lane.b32.xlu0 %v2964_v59, %s3106_s25 }
0x1745   :  { %v2966_v13 = vpop.eup %2965 }
0x1746   :  { %v1420_v5 = vadd.f32 1.0, %v2966_v13 }
0x1748   :  { %2967 = vrcp.f32 %v1420_v5 }
0x1752   :  { %v2968_v9 = vpop.eup %2967 }
0x1753   :  { %v1429_v16 = vmul.f32 %v2968_v9, %v1427_v61 }
0x17b6   :  { %v1432_v10 = vpop.permute.xlu0 %1431 }
0x17b7   :  { %v1434_v15 = vmul.f32 %v2968_v9, %v1432_v10 }
0x17b9   :  { %1436 = vrot.lane.b32.xlu0 %v1434_v15, %s3106_s25 }
0x182b   :  { %v1437_v7 = vpop.permute.xlu0 %1436 }
0x182c   :  { %v1439_v17 = vadd.f32 %v1437_v7, %v1429_v16  ;;  %v1304_v16 = vadd.f32 %v3393_v62, %v3466_v52 }
0x182e   :  { %2969 = vtanh.f32 %v1439_v17 }
0x1838   :  { %v2970_v18 = vpop.eup %2969 }
0x1839   :  { %1442 = vrot.lane.b32.xlu1 %v2970_v18, %s3106_s25 }
0x183d   :  { %1447 = vrot.lane.b32.xlu1 %v1439_v17, %s3107_s3 }
0x18ab   :  { %v1443_v19 = vpop.permute.xlu1 %1442 }
0x18ac   :  { %v1445_v20 = vmul.f32 %v2968_v9, %v1443_v19 }
0x18ae   :  { %1452 = vrot.lane.b32.xlu0 %v1445_v20, %s3108_s26 }
0x18af   :  { %v1448_v21 = vpop.permute.xlu1 %1447 }
0x18b0   :  { %1450 = vst.msk [vmem:[#allocation5] sm:$0xff] %vm216_vm1, %v1448_v21 }
0x18b7   :  { %v1543_v22 = vld [vmem:[#allocation5] sm:$0xff] }
0x18b8   :  { %1545 = vrot.lane.b32.xlu1 %v1543_v22, %s3106_s25 }
0x1920   :  { %v1453_v23 = vpop.permute.xlu0 %1452 }
0x1921   :  { %1455 = vst.msk [vmem:[#allocation4] sm:$0xff] %vm216_vm1, %v1453_v23 }
0x1928   :  { %v1457_v24 = vld [vmem:[#allocation4] sm:$0xff] }
0x1929   :  { %2695 = vmatmul.mubr.msk.f32.vlgmr.msra.gmra.mrb[12].mxu1 %vm216_vm1, %v1457_v24 }
0x192a   :  { %2854 = vmatpush3.bf16.msra.mxu1 %v3426_v41  ;;  %2716 = vmatprep.mubr.msk.f32.mxu1 %vm3104_vm0, %v3105_v1  ;;  %v1546_v34 = vpop.permute.xlu1 %1545 }
0x192b   :  { %2855 = vmatprep.subr.bf16.mxu1 %v3103_v0 }
0x192e   :  { %2857 = vmatpush3.bf16.msra.mxu1 %v3435_v44 }
0x192f   :  { %2864 = vmatprep.subr.bf16.mxu1 %v3103_v0 }
0x19fc   :  { %v1531_v26 = vpop.f32.mrb[12].mxu1 }
0x19fd   :  { %v1535_v27 = vadd.f32 %v1531_v26, %v1294_v25  ;;  %v2696_v28 = vpop.f32.mrb[13].mxu1 }
0x19ff   :  { %2971 = vtanh.f32 %v1535_v27  ;;  %v2429_v8 = vmul.f32 -1.442695, %v1535_v27 }
0x1a01   :  { %2973 = vpow2.f32 %v2429_v8 }
0x1a09   :  { %v2972_v29 = vpop.eup %2971 }
0x1a0a   :  { %1550 = vrot.lane.b32.xlu0 %v2972_v29, %s3106_s25 }
0x1a0b   :  { %v2974_v30 = vpop.eup %2973 }
0x1a0c   :  { %v1539_v31 = vadd.f32 1.0, %v2974_v30 }
0x1a0e   :  { %2975 = vrcp.f32 %v1539_v31 }
0x1a18   :  { %v2976_v32 = vpop.eup %2975 }
0x1a19   :  { %v1548_v35 = vmul.f32 %v2976_v32, %v1546_v34  ;;  %v1309_v34 = vadd.f32 %v3466_v52, %v3400_v4 }
0x1a7c   :  { %v1551_v33 = vpop.permute.xlu0 %1550 }
0x1a7d   :  { %v1553_v12 = vmul.f32 %v2976_v32, %v1551_v33 }
0x1a7f   :  { %1555 = vrot.lane.b32.xlu0 %v1553_v12, %s3106_s25 }
0x1af1   :  { %v1556_v60 = vpop.permute.xlu0 %1555 }
0x1af2   :  { %v1558_v6 = vadd.f32 %v1556_v60, %v1548_v35 }
0x1af4   :  { %2977 = vtanh.f32 %v1558_v6 }
0x1afe   :  { %v2978_v36 = vpop.eup %2977 }
0x1aff   :  { %1561 = vrot.lane.b32.xlu1 %v2978_v36, %s3106_s25 }
0x1b03   :  { %1566 = vrot.lane.b32.xlu1 %v1558_v6, %s3107_s3 }
0x1b71   :  { %v1562_v37 = vpop.permute.xlu1 %1561 }
0x1b72   :  { %v1564_v14 = vmul.f32 %v2976_v32, %v1562_v37 }
0x1b74   :  { %1571 = vrot.lane.b32.xlu0 %v1564_v14, %s3108_s26 }
0x1b75   :  { %v1567_v11 = vpop.permute.xlu1 %1566 }
0x1b76   :  { %1569 = vst.msk [vmem:[#allocation5] sm:$0xff] %vm216_vm1, %v1567_v11 }
0x1b7d   :  { %v1662_v38 = vld [vmem:[#allocation5] sm:$0xff] }
0x1b7e   :  { %1664 = vrot.lane.b32.xlu1 %v1662_v38, %s3106_s25 }
0x1be6   :  { %v1572_v39 = vpop.permute.xlu0 %1571 }
0x1be7   :  { %1574 = vst.msk [vmem:[#allocation4] sm:$0xff] %vm216_vm1, %v1572_v39 }
0x1bee   :  { %v1576_v40 = vld [vmem:[#allocation4] sm:$0xff] }
0x1bef   :  { %2706 = vmatmul.mubr.msk.f32.vlgmr.msra.gmra.mrb[22].mxu0 %vm216_vm1, %v1576_v40 }
0x1bf0   :  { %2860 = vmatpush3.bf16.msra.mxu0 %v3426_v41  ;;  %2727 = vmatprep.mubr.msk.f32.mxu0 %vm3104_vm0, %v3105_v1  ;;  %v1665_v57 = vpop.permute.xlu1 %1664 }
0x1bf1   :  { %2861 = vmatprep.subr.bf16.mxu0 %v3103_v0 }
0x1bf4   :  { %2863 = vmatpush3.bf16.msra.mxu0 %v3435_v44 }
0x1bf5   :  { %2870 = vmatprep.subr.bf16.mxu0 %v3103_v0 }
0x1cc2   :  { %v1650_v43 = vpop.f32.mrb[22].mxu0 }
0x1cc3   :  { %v1654_v45 = vadd.f32 %v1650_v43, %v1299_v42  ;;  %v2707_v46 = vpop.f32.mrb[23].mxu0 }
0x1cc5   :  { %2979 = vtanh.f32 %v1654_v45  ;;  %v2431_v48 = vmul.f32 -1.442695, %v1654_v45 }
0x1cc7   :  { %2981 = vpow2.f32 %v2431_v48 }
0x1ccf   :  { %v2980_v47 = vpop.eup %2979 }
0x1cd0   :  { %1669 = vrot.lane.b32.xlu0 %v2980_v47, %s3106_s25 }
0x1cd1   :  { %v2982_v49 = vpop.eup %2981 }
0x1cd2   :  { %v1658_v50 = vadd.f32 1.0, %v2982_v49 }
0x1cd4   :  { %2983 = vrcp.f32 %v1658_v50 }
0x1cde   :  { %v2984_v51 = vpop.eup %2983 }
0x1cdf   :  { %v1667_v58 = vmul.f32 %v2984_v51, %v1665_v57 }
0x1d42   :  { %v1670_v53 = vpop.permute.xlu0 %1669 }
0x1d43   :  { %v1672_v56 = vmul.f32 %v2984_v51, %v1670_v53 }
0x1d45   :  { %1674 = vrot.lane.b32.xlu0 %v1672_v56, %s3106_s25  ;;  %v1314_v56 = vadd.f32 %v3398_v3, %v3466_v52 }
0x1db7   :  { %v1675_v2 = vpop.permute.xlu0 %1674 }
0x1db8   :  { %v1677_v59 = vadd.f32 %v1675_v2, %v1667_v58 }
0x1dba   :  { %2985 = vtanh.f32 %v1677_v59 }
0x1dc4   :  { %v2986_v63 = vpop.eup %2985 }
0x1dc5   :  { %1680 = vrot.lane.b32.xlu1 %v2986_v63, %s3106_s25 }
0x1dc9   :  { %1685 = vrot.lane.b32.xlu1 %v1677_v59, %s3107_s3 }
0x1e37   :  { %v1681_v13 = vpop.permute.xlu1 %1680 }
0x1e38   :  { %v1683_v5 = vmul.f32 %v2984_v51, %v1681_v13 }
0x1e3a   :  { %1690 = vrot.lane.b32.xlu0 %v1683_v5, %s3108_s26 }
0x1e3b   :  { %v1686_v9 = vpop.permute.xlu1 %1685 }
0x1e3c   :  { %1688 = vst.msk [vmem:[#allocation5] sm:$0xff] %vm216_vm1, %v1686_v9 }
0x1e43   :  { %v1781_v10 = vld [vmem:[#allocation5] sm:$0xff] }
0x1e44   :  { %1783 = vrot.lane.b32.xlu1 %v1781_v10, %s3106_s25 }
0x1eac   :  { %v1691_v15 = vpop.permute.xlu0 %1690 }
0x1ead   :  { %1693 = vst.msk [vmem:[#allocation4] sm:$0xff] %vm216_vm1, %v1691_v15 }
0x1eb4   :  { %v1695_v61 = vld [vmem:[#allocation4] sm:$0xff] }
0x1eb5   :  { %2717 = vmatmul.mubr.msk.f32.vlgmr.msra.gmra.mrb[14].mxu1 %vm216_vm1, %v1695_v61 }
0x1eb6   :  { %2866 = vmatpush3.bf16.msra.mxu1 %v3426_v41  ;;  %2738 = vmatprep.mubr.msk.f32.mxu1 %vm3104_vm0, %v3105_v1  ;;  %v1784_v26 = vpop.permute.xlu1 %1783 }
0x1eb7   :  { %2867 = vmatprep.subr.bf16.mxu1 %v3103_v0 }
0x1eba   :  { %2869 = vmatpush3.bf16.msra.mxu1 %v3435_v44 }
0x1ebb   :  { %2876 = vmatprep.subr.bf16.mxu1 %v3103_v0 }
0x1f88   :  { %v1769_v7 = vpop.f32.mrb[14].mxu1 }
0x1f89   :  { %v1773_v17 = vadd.f32 %v1769_v7, %v1304_v16  ;;  %v2718_v18 = vpop.f32.mrb[15].mxu1 }
0x1f8b   :  { %2987 = vtanh.f32 %v1773_v17  ;;  %v2433_v20 = vmul.f32 -1.442695, %v1773_v17 }
0x1f8d   :  { %2989 = vpow2.f32 %v2433_v20 }
0x1f95   :  { %v2988_v19 = vpop.eup %2987 }
0x1f96   :  { %1788 = vrot.lane.b32.xlu0 %v2988_v19, %s3106_s25 }
0x1f97   :  { %v2990_v21 = vpop.eup %2989 }
0x1f98   :  { %v1777_v22 = vadd.f32 1.0, %v2990_v21 }
0x1f9a   :  { %2991 = vrcp.f32 %v1777_v22  ;;  %v1319_v22 = vadd.f32 %v3466_v52, %v3472_v55 }
0x1fa4   :  { %v2992_v23 = vpop.eup %2991 }
0x1fa5   :  { %v1786_v27 = vmul.f32 %v2992_v23, %v1784_v26 }
0x2008   :  { %v1789_v24 = vpop.permute.xlu0 %1788 }
0x2009   :  { %v1791_v25 = vmul.f32 %v2992_v23, %v1789_v24 }
0x200b   :  { %1793 = vrot.lane.b32.xlu0 %v1791_v25, %s3106_s25 }
0x207d   :  { %v1794_v62 = vpop.permute.xlu0 %1793 }
0x207e   :  { %v1796_v28 = vadd.f32 %v1794_v62, %v1786_v27 }
0x2080   :  { %2993 = vtanh.f32 %v1796_v28 }
0x208a   :  { %v2994_v29 = vpop.eup %2993 }
0x208b   :  { %1799 = vrot.lane.b32.xlu1 %v2994_v29, %s3106_s25 }
0x208f   :  { %1804 = vrot.lane.b32.xlu1 %v1796_v28, %s3107_s3 }
0x20fd   :  { %v1800_v8 = vpop.permute.xlu1 %1799 }
0x20fe   :  { %v1802_v30 = vmul.f32 %v2992_v23, %v1800_v8 }
0x2100   :  { %1809 = vrot.lane.b32.xlu0 %v1802_v30, %s3108_s26 }
0x2101   :  { %v1805_v31 = vpop.permute.xlu1 %1804 }
0x2102   :  { %1807 = vst.msk [vmem:[#allocation5] sm:$0xff] %vm216_vm1, %v1805_v31 }
0x2109   :  { %v1900_v32 = vld [vmem:[#allocation5] sm:$0xff] }
0x210a   :  { %1902 = vrot.lane.b32.xlu1 %v1900_v32, %s3106_s25 }
0x2172   :  { %v1810_v33 = vpop.permute.xlu0 %1809 }
0x2173   :  { %1812 = vst.msk [vmem:[#allocation4] sm:$0xff] %vm216_vm1, %v1810_v33 }
0x217a   :  { %v1814_v12 = vld [vmem:[#allocation4] sm:$0xff] }
0x217b   :  { %2728 = vmatmul.mubr.msk.f32.vlgmr.msra.gmra.mrb[24].mxu0 %vm216_vm1, %v1814_v12 }
0x217c   :  { %2872 = vmatpush3.bf16.msra.mxu0 %v3426_v41  ;;  %2749 = vmatprep.mubr.msk.f32.mxu0 %vm3104_vm0, %v3105_v1  ;;  %v1903_v42 = vpop.permute.xlu1 %1902 }
0x217d   :  { %2873 = vmatprep.subr.bf16.mxu0 %v3103_v0 }
0x2180   :  { %2875 = vmatpush3.bf16.msra.mxu0 %v3435_v44 }
0x2181   :  { %2882 = vmatprep.subr.bf16.mxu0 %v3103_v0 }
0x224e   :  { %v1888_v35 = vpop.f32.mrb[24].mxu0 }
0x224f   :  { %v1892_v60 = vadd.f32 %v1888_v35, %v1309_v34  ;;  %v2729_v6 = vpop.f32.mrb[25].mxu0 }
0x2251   :  { %2995 = vtanh.f32 %v1892_v60  ;;  %v2435_v37 = vmul.f32 -1.442695, %v1892_v60 }
0x2253   :  { %2997 = vpow2.f32 %v2435_v37  ;;  %v1324_v37 = vadd.f32 %v3470_v54, %v3466_v52 }
0x225b   :  { %v2996_v36 = vpop.eup %2995 }
0x225c   :  { %1907 = vrot.lane.b32.xlu0 %v2996_v36, %s3106_s25 }
0x225d   :  { %v2998_v14 = vpop.eup %2997 }
0x225e   :  { %v1896_v11 = vadd.f32 1.0, %v2998_v14 }
0x2260   :  { %2999 = vrcp.f32 %v1896_v11 }
0x226a   :  { %v3000_v38 = vpop.eup %2999 }
0x226b   :  { %v1905_v43 = vmul.f32 %v3000_v38, %v1903_v42 }
0x22ce   :  { %v1908_v39 = vpop.permute.xlu0 %1907 }
0x22cf   :  { %v1910_v40 = vmul.f32 %v3000_v38, %v1908_v39 }
0x22d1   :  { %1912 = vrot.lane.b32.xlu0 %v1910_v40, %s3106_s25 }
0x2343   :  { %v1913_v4 = vpop.permute.xlu0 %1912 }
0x2344   :  { %v1915_v45 = vadd.f32 %v1913_v4, %v1905_v43 }
0x2346   :  { %3001 = vtanh.f32 %v1915_v45 }
0x2350   :  { %v3002_v46 = vpop.eup %3001 }
0x2351   :  { %1918 = vrot.lane.b32.xlu1 %v3002_v46, %s3106_s25 }
0x2355   :  { %1923 = vrot.lane.b32.xlu1 %v1915_v45, %s3107_s3 }
0x23c3   :  { %v1919_v47 = vpop.permute.xlu1 %1918 }
0x23c4   :  { %v1921_v48 = vmul.f32 %v3000_v38, %v1919_v47 }
0x23c6   :  { %1928 = vrot.lane.b32.xlu0 %v1921_v48, %s3108_s26 }
0x23c7   :  { %v1924_v49 = vpop.permute.xlu1 %1923 }
0x23c8   :  { %1926 = vst.msk [vmem:[#allocation5] sm:$0xff] %vm216_vm1, %v1924_v49 }
0x23cf   :  { %v2019_v50 = vld [vmem:[#allocation5] sm:$0xff] }
0x23d0   :  { %2021 = vrot.lane.b32.xlu1 %v2019_v50, %s3106_s25  ;;  %v2290_v50 = vld [vmem:[#allocation9] sm:$0xff] }
0x2438   :  { %v1929_v51 = vpop.permute.xlu0 %1928 }
0x2439   :  { %1931 = vst.msk [vmem:[#allocation4] sm:$0xff] %vm216_vm1, %v1929_v51  ;;  %v2291_v51 = vld [vmem:[#allocation9 + $0x8] sm:$0xff] }
0x2440   :  { %v1933_v53 = vld [vmem:[#allocation4] sm:$0xff] }
0x2441   :  { %2739 = vmatmul.mubr.msk.f32.vlgmr.msra.gmra.mrb[16].mxu1 %vm216_vm1, %v1933_v53  ;;  %v2883_v53 = vpack.c.bf16 %v2291_v51, %v2290_v50 }
0x2442   :  { %2878 = vmatpush3.bf16.msra.mxu1 %v3426_v41  ;;  %2760 = vmatprep.mubr.msk.f32.mxu1 %vm3104_vm0, %v3105_v1 }
0x2443   :  { %2879 = vmatprep.subr.bf16.mxu1 %v3103_v0 }
0x2446   :  { %2881 = vmatpush3.bf16.msra.mxu1 %v3435_v44  ;;  %v2022_v44 = vpop.permute.xlu1 %2021 }
0x2514   :  { %v2007_v57 = vpop.f32.mrb[16].mxu1 }
0x2515   :  { %v2011_v58 = vadd.f32 %v2007_v57, %v1314_v56  ;;  %v2740_v2 = vpop.f32.mrb[17].mxu1  ;;  %v2292_v56 = vld [vmem:[#allocation9 + $0x10] sm:$0xff]  ;;  %v2293_v57 = vld [vmem:[#allocation9 + $0x18] sm:$0xff] }
0x2517   :  { %3003 = vtanh.f32 %v2011_v58  ;;  %v2437_v63 = vmul.f32 -1.442695, %v2011_v58  ;;  %v2886_v58 = vpack.c.bf16 %v2293_v57, %v2292_v56 }
0x2519   :  { %3005 = vpow2.f32 %v2437_v63 }
0x2521   :  { %v3004_v59 = vpop.eup %3003 }
0x2522   :  { %2026 = vrot.lane.b32.xlu0 %v3004_v59, %s3106_s25 }
0x2523   :  { %v3006_v41 = vpop.eup %3005 }
0x2524   :  { %v2015_v13 = vadd.f32 1.0, %v3006_v41 }
0x2526   :  { %3007 = vrcp.f32 %v2015_v13 }
0x2530   :  { %v3008_v5 = vpop.eup %3007 }
0x2531   :  { %v2024_v15 = vmul.f32 %v3008_v5, %v2022_v44 }
0x2594   :  { %v2027_v9 = vpop.permute.xlu0 %2026 }
0x2595   :  { %v2029_v10 = vmul.f32 %v3008_v5, %v2027_v9 }
0x2597   :  { %2031 = vrot.lane.b32.xlu0 %v2029_v10, %s3106_s25 }
0x2609   :  { %v2032_v3 = vpop.permute.xlu0 %2031 }
0x260a   :  { %v2034_v61 = vadd.f32 %v2032_v3, %v2024_v15 }
0x260c   :  { %3009 = vtanh.f32 %v2034_v61 }
0x2616   :  { %v3010_v16 = vpop.eup %3009 }
0x2617   :  { %2037 = vrot.lane.b32.xlu1 %v3010_v16, %s3106_s25 }
0x261b   :  { %2042 = vrot.lane.b32.xlu1 %v2034_v61, %s3107_s3 }
0x2689   :  { %v2038_v7 = vpop.permute.xlu1 %2037 }
0x268a   :  { %v2040_v17 = vmul.f32 %v3008_v5, %v2038_v7  ;;  %v2442_v5 = vld [vmem:[%s3614_s8] ss:$0 sm:$0xff] }
0x268c   :  { %2047 = vrot.lane.b32.xlu0 %v2040_v17, %s3108_s26 }
0x268d   :  { %v2043_v18 = vpop.permute.xlu1 %2042 }
0x268e   :  { %2045 = vst.msk [vmem:[#allocation5] sm:$0xff] %vm216_vm1, %v2043_v18 }
0x2695   :  { %v2138_v19 = vld [vmem:[#allocation5] sm:$0xff] }
0x2696   :  { %2140 = vrot.lane.b32.xlu1 %v2138_v19, %s3106_s25 }
0x26fe   :  { %v2048_v20 = vpop.permute.xlu0 %2047 }
0x26ff   :  { %2050 = vst.msk [vmem:[#allocation4] sm:$0xff] %vm216_vm1, %v2048_v20 }
0x2706   :  { %v2052_v21 = vld [vmem:[#allocation4] sm:$0xff] }
0x2707   :  { %2750 = vmatmul.mubr.msk.f32.vlgmr.msra.gmra.mrb[26].mxu0 %vm216_vm1, %v2052_v21 }
0x2708   :  { %2771 = vmatprep.mubr.msk.f32.mxu0 %vm3104_vm0, %v3105_v1  ;;  %v2141_v1 = vpop.permute.xlu1 %2140  ;;  %2884 = vmatpush3.bf16.msra.mxu0 %v2883_v53 }
0x2709   :  { %2885 = vmatprep.subr.bf16.mxu0 %v3103_v0 }
0x270c   :  { %2887 = vmatpush3.bf16.msra.mxu0 %v2886_v58 }
0x27da   :  { %v2126_v23 = vpop.f32.mrb[26].mxu0 }
0x27db   :  { %v2130_v24 = vadd.f32 %v2126_v23, %v1319_v22  ;;  %v2751_v25 = vpop.f32.mrb[27].mxu0 }
0x27dd   :  { %3011 = vtanh.f32 %v2130_v24  ;;  %v2439_v27 = vmul.f32 -1.442695, %v2130_v24 }
0x27df   :  { %3013 = vpow2.f32 %v2439_v27 }
0x27e7   :  { %v3012_v26 = vpop.eup %3011 }
0x27e8   :  { %2145 = vrot.lane.b32.xlu0 %v3012_v26, %s3106_s25 }
0x27e9   :  { %v3014_v62 = vpop.eup %3013 }
0x27ea   :  { %v2134_v28 = vadd.f32 1.0, %v3014_v62 }
0x27ec   :  { %3015 = vrcp.f32 %v2134_v28 }
0x27f6   :  { %v3016_v29 = vpop.eup %3015 }
0x27f7   :  { %v2143_v31 = vmul.f32 %v3016_v29, %v2141_v1 }
0x285a   :  { %v2146_v8 = vpop.permute.xlu0 %2145 }
0x285b   :  { %v2148_v30 = vmul.f32 %v3016_v29, %v2146_v8 }
0x285d   :  { %2150 = vrot.lane.b32.xlu0 %v2148_v30, %s3106_s25 }
0x28cf   :  { %v2151_v55 = vpop.permute.xlu0 %2150 }
0x28d0   :  { %v2153_v32 = vadd.f32 %v2151_v55, %v2143_v31 }
0x28d2   :  { %3017 = vtanh.f32 %v2153_v32 }
0x28dc   :  { %v3018_v33 = vpop.eup %3017 }
0x28dd   :  { %2156 = vrot.lane.b32.xlu1 %v3018_v33, %s3106_s25 }
0x28e1   :  { %2161 = vrot.lane.b32.xlu1 %v2153_v32, %s3107_s3 }
0x294f   :  { %v2157_v12 = vpop.permute.xlu1 %2156 }
0x2950   :  { %v2159_v34 = vmul.f32 %v3016_v29, %v2157_v12 }
0x2952   :  { %2166 = vrot.lane.b32.xlu0 %v2159_v34, %s3108_s26 }
0x2953   :  { %v2162_v35 = vpop.permute.xlu1 %2161 }
0x2954   :  { %2164 = vst.msk [vmem:[#allocation5] sm:$0xff] %vm216_vm1, %v2162_v35 }
0x295b   :  { %v2257_v60 = vld [vmem:[#allocation5] sm:$0xff] }
0x295c   :  { %2259 = vrot.lane.b32.xlu1 %v2257_v60, %s3106_s25 }
0x29c4   :  { %v2167_v6 = vpop.permute.xlu0 %2166 }
0x29c5   :  { %2169 = vst.msk [vmem:[#allocation4] sm:$0xff] %vm216_vm1, %v2167_v6 }
0x29cc   :  { %v2171_v36 = vld [vmem:[#allocation4] sm:$0xff] }
0x29cd   :  { %2761 = vmatmul.mubr.msk.f32.vlgmr.msra.gmra.mrb[18].mxu1 %vm216_vm1, %v2171_v36 }
0x29ce   :  { %v2260_v47 = vpop.permute.xlu1 %2259 }
0x2aa0   :  { %v2245_v14 = vpop.f32.mrb[18].mxu1 }
0x2aa1   :  { %v2249_v11 = vadd.f32 %v2245_v14, %v1324_v37  ;;  %v2762_v38 = vpop.f32.mrb[19].mxu1 }
0x2aa3   :  { %3019 = vtanh.f32 %v2249_v11  ;;  %v2441_v40 = vmul.f32 -1.442695, %v2249_v11 }
0x2aa5   :  { %3021 = vpow2.f32 %v2441_v40 }
0x2aad   :  { %v3020_v39 = vpop.eup %3019 }
0x2aae   :  { %2264 = vrot.lane.b32.xlu0 %v3020_v39, %s3106_s25 }
0x2aaf   :  { %v3022_v42 = vpop.eup %3021 }
0x2ab0   :  { %v2253_v43 = vadd.f32 1.0, %v3022_v42 }
0x2ab2   :  { %3023 = vrcp.f32 %v2253_v43 }
0x2abc   :  { %v3024_v4 = vpop.eup %3023 }
0x2abd   :  { %v2262_v48 = vmul.f32 %v3024_v4, %v2260_v47 }
0x2b20   :  { %v2265_v45 = vpop.permute.xlu0 %2264 }
0x2b21   :  { %v2267_v46 = vmul.f32 %v3024_v4, %v2265_v45 }
0x2b23   :  { %2269 = vrot.lane.b32.xlu0 %v2267_v46, %s3106_s25 }
0x2b95   :  { %v2270_v52 = vpop.permute.xlu0 %2269 }
0x2b96   :  { %v2272_v54 = vadd.f32 %v2270_v52, %v2262_v48 }
0x2b98   :  { %3025 = vtanh.f32 %v2272_v54 }
0x2ba2   :  { %v3026_v49 = vpop.eup %3025 }
0x2ba3   :  { %2275 = vrot.lane.b32.xlu1 %v3026_v49, %s3106_s25 }
0x2ba7   :  { %2280 = vrot.lane.b32.xlu1 %v2272_v54, %s3107_s3  ;;  %s3109_s3 = smov [#allocation11]  }
0x2ba8   :  { %s2382_s12 = sshll.u32 %s3109_s3, 4  ;;  %s2383_s12 = int_to_ptr.vmem [resolvable:$true] %s2382_s12 }
0x2ba9   :  { %p3076_p3 = scmp.lt.s32.totalorder %s2383_s12, %s2383_s12 }
0x2c15   :  { %v2276_v2 = vpop.permute.xlu1 %2275 }
0x2c16   :  { %v2278_v59 = vmul.f32 %v3024_v4, %v2276_v2 }
0x2c18   :  { %2285 = vrot.lane.b32.xlu0 %v2278_v59, %s3108_s26  ;;  %s3071_s26 = scalar_lea.vmem %s2383_s12, 128 }
0x2c19   :  { %v2281_v63 = vpop.permute.xlu1 %2280  ;;  %p3072_p2 = scmp.ne.s32.totalorder %s2383_s12, %s3071_s26  ;;  %p3077_p4 = scmp.lt.s32.totalorder %s3071_s26, %s3071_s26 }
0x2c1a   :  { %2283 = vst.msk [vmem:[#allocation5] sm:$0xff] %vm216_vm1, %v2281_v63 }
0x2c1b   :  { %p3078_p5 = por %p3077_p4, %p3076_p3 }
0x2c1d   :  { %p3079_p6 = pnand %p3078_p5, %p3072_p2 }
0x2c8a   :  { %v2286_v41 = vpop.permute.xlu0 %2285 }
0x2c8b   :  { %2288 = vst.msk [vmem:[#allocation4] sm:$0xff] %vm216_vm1, %v2286_v41 }
0x2c92   :  { %v2289_v13 = vld [vmem:[#allocation4] sm:$0xff] }
0x2c93   :  { %2772 = vmatmul.mubr.msk.f32.vlgmr.msra.gmra.mrb[28].mxu0 %vm216_vm1, %v2289_v13 }
0x2d66   :  { %v2370_v9 = vpop.f32.mrb[28].mxu0 }
0x2d67   :  { %v2371_v0 = vadd.f32 %v2442_v5, %v2370_v9  ;;  %v2773_v10 = vpop.f32.mrb[29].mxu0 }
0x2d69   :  { %v2374_v44 = vmax.f32 %v2371_v0, 0.0 }
0x2d6b   :  { %2375 = vst [vmem:[#allocation11] sm:$0xff] %v2374_v44 }
0x2d6c   :  { %3082 = shalt.err (!%p3079_p6)
}
0x2d6d   :  { %s3083_s7 = scalar_lea.hbm %s3615_s9, 128 }
0x2d6e   :  { %p3084_p7 = scmp.ne.s32.totalorder %s3615_s9, %s3083_s7  ;;  %p3087_p8 = scmp.lt.u32.totalorder %s3083_s7, %s3615_s9 }
0x2d70   :  { %p3089_p9 = pnand %p3087_p8, %p3084_p7 }
0x2d72   :  { %3092 = shalt.err (!%p3089_p9)
}
0x2d73   :  { %2385 = dma.vmem_to_hbm [thread:$0]  %s2383_s12, 128, %s3615_s9, [#allocation8]  }
0x2d74   :  { %3097 = dma.done.wait [#allocation8], 128  }
0x2d75   :  { %3098 = vsyncadd [#allocation8], 4294967168 }
0x2d76   :  { %2389 = vsyncpa [#allocation7], 1 }
0x2d77   :  { %2390 = vsyncpa [#allocation10], 1 }
0x2d78   :  { %2391 = vsyncpa [#allocation8], 1 }

</bundles_post_ra>
